<compile_context>
chip_gen: v6e
topology: v6e:2x2x1
jax: 0.10.0
libtpu: 0.0.40
codegen_flags: <defaults>
</compile_context>

<pallas_src>
import functools

import jax
import jax.numpy as jnp
from jax.experimental import pallas as pl
from jax.experimental.pallas import tpu as pltpu

C = 256          # channels (in == out)
H = 14           # height
W = 14           # width
HW = H * W       # flattened spatial size (196)
K = 3            # conv taps along the width axis
CT = 128         # output-channel tile (grid of 2)


def _kernel(xhi_ref, xlo_ref, w_ref, s1_ref, s0_ref, y_ref):
    # xhi_ref/xlo_ref : (3C, HW) bf16  tap-unrolled, height-rolled input slabs
    # w_ref           : (CT, 3C) bf16  flattened W2 for this output-channel tile
    # s1_ref/s0_ref   : (CT, 1)  f32   the two W1 columns for this tile
    # y_ref           : (CT, HW) f32   output tile
    y_ref[...] = s1_ref[...] * jnp.dot(
        w_ref[...], xhi_ref[...], preferred_element_type=jnp.float32)
    y_ref[...] += s0_ref[...] * jnp.dot(
        w_ref[...], xlo_ref[...], preferred_element_type=jnp.float32)


def _pallas_core(x_hi, x_lo, w_flat, s1, s0):
    grid_spec = pltpu.PrefetchScalarGridSpec(
        num_scalar_prefetch=0,
        grid=(C // CT,),
        in_specs=[
            pl.BlockSpec((K * C, HW), lambda i: (0, 0)),   # same block every step
            pl.BlockSpec((K * C, HW), lambda i: (0, 0)),   # same block every step
            pl.BlockSpec((CT, K * C), lambda i: (i, 0)),
            pl.BlockSpec((CT, 1), lambda i: (i, 0)),
            pl.BlockSpec((CT, 1), lambda i: (i, 0)),
        ],
        out_specs=pl.BlockSpec((CT, HW), lambda i: (i, 0)),
    )
    return pl.pallas_call(
        _kernel,
        out_shape=jax.ShapeDtypeStruct((C, HW), jnp.float32),
        grid_spec=grid_spec,
        compiler_params=pltpu.CompilerParams(
            dimension_semantics=("parallel",)),
    )(x_hi, x_lo, w_flat, s1, s0)


def _tap_slab(x_chw, r):
    """Height-roll x by r rows, then lay out the 3 width taps (zero-padded 1x3
    conv) as a (3*C, H*W) slab whose row index is k*C + j."""
    xr = jnp.roll(x_chw, r, axis=1)                         # (C, H, W)
    xp = jnp.pad(xr, ((0, 0), (0, 0), (1, 1)))              # zero pad along width
    taps = jnp.stack([xp[:, :, k:k + W] for k in range(K)], axis=0)  # (K, C, H, W)
    return taps.reshape(K * C, HW).astype(jnp.bfloat16)


@functools.partial(jax.jit, static_argnums=(3,))
def kernel_generated_4_forward(x, w1, w2, shift_direction):
    """x: (1, 256, 14, 14); w1: (256, 2); w2: (256, 256, 3)."""
    # TODO(synk): the module's shift_direction is a host-side random draw at
    # construction time; it is handled here as a static Python argument.
    if shift_direction == 1:
        r_hi, r_lo = 2, 1          # paired with W1[:, 1] / W1[:, 0]
    else:
        r_hi, r_lo = -1, -2

    x_chw = x.reshape(C, H, W)
    x_hi = _tap_slab(x_chw, r_hi)
    x_lo = _tap_slab(x_chw, r_lo)

    # W2_flat[i, k*C + j] = w2[i, j, k]
    w_flat = jnp.transpose(w2, (0, 2, 1)).reshape(C, K * C).astype(jnp.bfloat16)
    s1 = w1[:, 1:2].astype(jnp.float32)
    s0 = w1[:, 0:1].astype(jnp.float32)

    y = _pallas_core(x_hi, x_lo, w_flat, s1, s0)
    return y.reshape(1, C, H, W)


def reference(x, w1, w2, shift_direction):
    """Pure-JAX op-by-op mirror of the PyTorch forward (for self-check)."""
    hi = jax.lax.Precision.HIGHEST
    t3 = x.reshape(1, 3584, 14, 1)
    tp = jnp.pad(t3, ((0, 0), (0, 0), (1, 1), (0, 0)))
    # torch.nn.functional.unfold with kernel (3,1), padding (1,0)
    patches = jnp.stack([tp[0, :, k:k + 14, 0] for k in range(3)], axis=1)  # (3584,3,14)
    t3u = patches.reshape(1, 256, 14, 3, 14)
    t4 = jnp.einsum('ljnkm,ijk->linm', t3u, w2, precision=hi)
    t5 = jnp.einsum('kiml,ij->kimjl', t4, w1, precision=hi)
    t6 = jnp.roll(t5, shift_direction, axis=2)
    t6 = t6.reshape(1, 256, 28, 14)
    t6 = jnp.roll(t6, shift_direction, axis=2)
    t6 = t6.reshape(1, 256, 14, 2, 14)
    return jnp.sum(t6, axis=3)


if __name__ == "__main__":
    key = jax.random.PRNGKey(0)
    k1, k2, k3 = jax.random.split(key, 3)
    w1 = jax.random.normal(k1, (256, 2), jnp.float32)        # weights[0]
    w2 = jax.random.normal(k2, (256, 256, 3), jnp.float32)   # weights[1]
    x = jax.random.normal(k3, (1, 256, 14, 14), jnp.float32)

    for shift_direction in (1, -1):
        y = jax.block_until_ready(
            kernel_generated_4_forward(x, w1, w2, shift_direction))
        assert y.shape == (1, 256, 14, 14)
        y_ref = reference(x, w1, w2, shift_direction)
        rel_err = float(jnp.max(jnp.abs(y - y_ref)) /
                        (jnp.max(jnp.abs(y_ref)) + 1e-6))
        assert rel_err < 1e-2, (
            f"shift {shift_direction}: mismatch vs reference, rel err {rel_err}")

    print("KERNEL_OK")
</pallas_src>

<mosaic_0001>
module attributes {stable_mosaic.version = 11 : i64} {
  func.func @_kernel(%arg0: i32, %arg1: memref<768x196xbf16, #tpu.memory_space<vmem>>, %arg2: memref<768x196xbf16, #tpu.memory_space<vmem>>, %arg3: memref<128x768xbf16, #tpu.memory_space<vmem>>, %arg4: memref<128x1xf32, #tpu.memory_space<vmem>>, %arg5: memref<128x1xf32, #tpu.memory_space<vmem>>, %arg6: memref<128x196xf32, #tpu.memory_space<vmem>>) attributes {dimension_semantics = [#tpu.dimension_semantics<parallel>], iteration_bounds = array<i64: 2>, scalar_prefetch = 0 : i64, scratch_operands = 0 : i64, tpu.core_type = #tpu.core_type<tc>, window_params = [{pipeline_mode = #tpu.pipeline_mode<synchronous>, transform_indices = @transform_0, window_bounds = array<i64: 768, 196>}, {pipeline_mode = #tpu.pipeline_mode<synchronous>, transform_indices = @transform_1, window_bounds = array<i64: 768, 196>}, {transform_indices = @transform_2, window_bounds = array<i64: 128, 768>}, {transform_indices = @transform_3, window_bounds = array<i64: 128, 1>}, {transform_indices = @transform_4, window_bounds = array<i64: 128, 1>}, {transform_indices = @transform_5, window_bounds = array<i64: 128, 196>}]} {
    %c0 = arith.constant 0 : index
    %c0_0 = arith.constant 0 : index
    %0 = vector.load %arg4[%c0, %c0_0] : memref<128x1xf32, #tpu.memory_space<vmem>>, vector<128x1xf32>
    %c0_1 = arith.constant 0 : index
    %c0_2 = arith.constant 0 : index
    %1 = vector.load %arg3[%c0_1, %c0_2] : memref<128x768xbf16, #tpu.memory_space<vmem>>, vector<128x768xbf16>
    %c0_3 = arith.constant 0 : index
    %c0_4 = arith.constant 0 : index
    %2 = vector.load %arg1[%c0_3, %c0_4] : memref<768x196xbf16, #tpu.memory_space<vmem>>, vector<768x196xbf16>
    %cst = arith.constant dense<0.000000e+00> : vector<128x196xf32>
    %3 = tpu.matmul %1, %2, %cst {dimension_numbers = #tpu.dot_dimension_numbers<[1], [0], [0], [1], [0, 0, 1, 1], [], []>} : vector<128x768xbf16>, vector<768x196xbf16>, vector<128x196xf32> -> vector<128x196xf32>
    %4 = vector.broadcast %0 : vector<128x1xf32> to vector<128x196xf32>
    %5 = arith.mulf %4, %3 : vector<128x196xf32>
    %c0_5 = arith.constant 0 : index
    %c0_6 = arith.constant 0 : index
    %6 = vector.load %arg6[%c0_5, %c0_6] : memref<128x196xf32, #tpu.memory_space<vmem>>, vector<128x196xf32>
    tpu.vector_store %arg6[%c0_5, %c0_6], %5 {strides = array<i32>} : memref<128x196xf32, #tpu.memory_space<vmem>>, vector<128x196xf32>,
    %c0_7 = arith.constant 0 : index
    %c0_8 = arith.constant 0 : index
    %7 = vector.load %arg6[%c0_7, %c0_8] : memref<128x196xf32, #tpu.memory_space<vmem>>, vector<128x196xf32>
    %c0_9 = arith.constant 0 : index
    %c0_10 = arith.constant 0 : index
    %8 = vector.load %arg5[%c0_9, %c0_10] : memref<128x1xf32, #tpu.memory_space<vmem>>, vector<128x1xf32>
    %c0_11 = arith.constant 0 : index
    %c0_12 = arith.constant 0 : index
    %9 = vector.load %arg3[%c0_11, %c0_12] : memref<128x768xbf16, #tpu.memory_space<vmem>>, vector<128x768xbf16>
    %c0_13 = arith.constant 0 : index
    %c0_14 = arith.constant 0 : index
    %10 = vector.load %arg2[%c0_13, %c0_14] : memref<768x196xbf16, #tpu.memory_space<vmem>>, vector<768x196xbf16>
    %cst_15 = arith.constant dense<0.000000e+00> : vector<128x196xf32>
    %11 = tpu.matmul %9, %10, %cst_15 {dimension_numbers = #tpu.dot_dimension_numbers<[1], [0], [0], [1], [0, 0, 1, 1], [], []>} : vector<128x768xbf16>, vector<768x196xbf16>, vector<128x196xf32> -> vector<128x196xf32>
    %12 = vector.broadcast %8 : vector<128x1xf32> to vector<128x196xf32>
    %13 = arith.mulf %12, %11 : vector<128x196xf32>
    %14 = arith.addf %7, %13 : vector<128x196xf32>
    %c0_16 = arith.constant 0 : index
    %c0_17 = arith.constant 0 : index
    %15 = vector.load %arg6[%c0_16, %c0_17] : memref<128x196xf32, #tpu.memory_space<vmem>>, vector<128x196xf32>
    tpu.vector_store %arg6[%c0_16, %c0_17], %14 {strides = array<i32>} : memref<128x196xf32, #tpu.memory_space<vmem>>, vector<128x196xf32>,
    return
  }
  func.func @transform_0(%arg0: i32) -> (i32, i32) {
    %c0_i32 = arith.constant 0 : i32
    %c0_i32_0 = arith.constant 0 : i32
    %c0_i32_1 = arith.constant 0 : i32
    return %c0_i32, %c0_i32_0 : i32, i32
  }
  func.func @transform_1(%arg0: i32) -> (i32, i32) {
    %c0_i32 = arith.constant 0 : i32
    %c0_i32_0 = arith.constant 0 : i32
    %c0_i32_1 = arith.constant 0 : i32
    return %c0_i32, %c0_i32_0 : i32, i32
  }
  func.func @transform_2(%arg0: i32) -> (i32, i32) {
    %c0_i32 = arith.constant 0 : i32
    %c0_i32_0 = arith.constant 0 : i32
    return %arg0, %c0_i32 : i32, i32
  }
  func.func @transform_3(%arg0: i32) -> (i32, i32) {
    %c0_i32 = arith.constant 0 : i32
    %c0_i32_0 = arith.constant 0 : i32
    return %arg0, %c0_i32 : i32, i32
  }
  func.func @transform_4(%arg0: i32) -> (i32, i32) {
    %c0_i32 = arith.constant 0 : i32
    %c0_i32_0 = arith.constant 0 : i32
    return %arg0, %c0_i32 : i32, i32
  }
  func.func @transform_5(%arg0: i32) -> (i32, i32) {
    %c0_i32 = arith.constant 0 : i32
    %c0_i32_0 = arith.constant 0 : i32
    return %arg0, %c0_i32 : i32, i32
  }
}

</mosaic_0001>

<bundles_post_ra>
// kernel: kernel_generated_4_forward.1
= control target key start
LH: loop header
LB: loop body
LE: loop exit
PB: predicated region body
PF: predicated region fallthrough
CT: control target
= control target key end

     0   :  { %s3878_s18 = smov 0   ;;  %s5128_s0 = inlined_call_operand.vmem [shape: bf16[768,196], index: 0, kind: input, shape index: {}]   ;;  %s5129_s1 = inlined_call_operand.vmem [shape: bf16[768,196], index: 1, kind: input, shape index: {}]   ;;  %s5130_s2 = inlined_call_operand.vmem [shape: bf16[256,768], index: 2, kind: input, shape index: {}]   ;;  %s5131_s3 = inlined_call_operand.vmem [shape: f32[256,1], index: 3, kind: input, shape index: {}]   ;;  %s5132_s4 = inlined_call_operand.vmem [shape: f32[256,1], index: 4, kind: input, shape index: {}]   ;;  %s5133_s5 = inlined_call_operand.vmem [shape: f32[256,196], index: 5, kind: output, shape index: {}]  }
   0x1 LB: > { %s3150_s19 = sadd.s32 4294967295, %s3845_s18   ;;  %p3154_p0 = scmp.ge.s32.totalorder %s3845_s18, 1  ;;  %s3845_s18 = sphi %s3878_s18, %s15_s18  }
   0x2   : > { %p211_p1 = scmp.lt.s32.totalorder %s3845_s18, 3 }
   0x4   : > { %p212_p2 = pnand %p3154_p0, %p211_p1 }
   0x6   : > { %215 = sbr.rel (%p212_p2) target bundleno = 468 (0x1d4), region = 40 }
   0xb   : > { %v3467_v0 = vld [vmem:[%s5128_s0 + $0x74] ss:$8 sps:$4 sm:$0xff]   ;;  %v3471_v2 = vld [vmem:[%s5128_s0 + $0x70] ss:$8 sps:$4 sm:$0xff]   ;;  %v3473_v4 = vld [vmem:[%s5128_s0 + $0x64] ss:$8 sps:$4 sm:$0xff]  }
   0xc   : > { %v3469_v1 = vld [vmem:[%s5128_s0 + $0x174] ss:$8 sps:$4 sm:$0xff]   ;;  %1157 = vmatprep.subr.bf16.mxu0 %v3467_v0  ;;  %v3472_v3 = vld [vmem:[%s5128_s0 + $0x170] ss:$8 sps:$4 sm:$0xff]   ;;  %v3475_v5 = vld [vmem:[%s5128_s0 + $0x164] ss:$8 sps:$4 sm:$0xff]  }
   0xd   : > { %1270 = vmatprep.subr.bf16.mxu1 %v3469_v1  ;;  %1158 = vmatpush1.bf16.msra.mxu0 %v3471_v2  ;;  %v3477_v6 = vld [vmem:[%s5128_s0 + $0x60] ss:$8 sps:$4 sm:$0xff]   ;;  %v3479_v8 = vld [vmem:[%s5128_s0 + $0x54] ss:$8 sps:$4 sm:$0xff]   ;;  %v3483_v10 = vld [vmem:[%s5128_s0 + $0x50] ss:$8 sps:$4 sm:$0xff]  }
   0xe   : > { %1271 = vmatpush1.bf16.msra.mxu1 %v3472_v3  ;;  %1159 = vmatprep.subr.bf16.mxu0 %v3473_v4  ;;  %v3478_v7 = vld [vmem:[%s5128_s0 + $0x160] ss:$8 sps:$4 sm:$0xff]   ;;  %v3481_v9 = vld [vmem:[%s5128_s0 + $0x154] ss:$8 sps:$4 sm:$0xff]   ;;  %v3484_v11 = vld [vmem:[%s5128_s0 + $0x150] ss:$8 sps:$4 sm:$0xff]  }
   0xf   : > { %1272 = vmatprep.subr.bf16.mxu1 %v3475_v5  ;;  %v3485_v12 = vld [vmem:[%s5128_s0 + $0x44] ss:$8 sps:$4 sm:$0xff]   ;;  %v3489_v14 = vld [vmem:[%s5128_s0 + $0x40] ss:$8 sps:$4 sm:$0xff]   ;;  %v3491_v16 = vld [vmem:[%s5128_s0 + $0x34] ss:$8 sps:$4 sm:$0xff]  }
  0x10   : > { %v3487_v13 = vld [vmem:[%s5128_s0 + $0x144] ss:$8 sps:$4 sm:$0xff]   ;;  %v3490_v15 = vld [vmem:[%s5128_s0 + $0x140] ss:$8 sps:$4 sm:$0xff]   ;;  %v3493_v17 = vld [vmem:[%s5128_s0 + $0x134] ss:$8 sps:$4 sm:$0xff]  }
  0x11   : > { %1160 = vmatpush1.bf16.msra.mxu0 %v3477_v6  ;;  %v3495_v18 = vld [vmem:[%s5128_s0 + $0x30] ss:$8 sps:$4 sm:$0xff]   ;;  %v3497_v20 = vld [vmem:[%s5128_s0 + $0x24] ss:$8 sps:$4 sm:$0xff]   ;;  %v3501_v22 = vld [vmem:[%s5128_s0 + $0x20] ss:$8 sps:$4 sm:$0xff]  }
  0x12   : > { %1273 = vmatpush1.bf16.msra.mxu1 %v3478_v7  ;;  %1161 = vmatprep.subr.bf16.mxu0 %v3479_v8  ;;  %v3496_v19 = vld [vmem:[%s5128_s0 + $0x130] ss:$8 sps:$4 sm:$0xff]   ;;  %v3499_v21 = vld [vmem:[%s5128_s0 + $0x124] ss:$8 sps:$4 sm:$0xff]   ;;  %v3502_v23 = vld [vmem:[%s5128_s0 + $0x120] ss:$8 sps:$4 sm:$0xff]  }
  0x13   : > { %1274 = vmatprep.subr.bf16.mxu1 %v3481_v9  ;;  %v3503_v24 = vld [vmem:[%s5128_s0 + $0x14] ss:$8 sps:$4 sm:$0xff]   ;;  %v3507_v26 = vld [vmem:[%s5128_s0 + $0x10] ss:$8 sps:$4 sm:$0xff]   ;;  %v3509_v28 = vld [vmem:[%s5128_s0 + $0x4] ss:$8 sps:$4 sm:$0xff]  }
  0x14   : > { %v3505_v25 = vld [vmem:[%s5128_s0 + $0x114] ss:$8 sps:$4 sm:$0xff]   ;;  %v3508_v27 = vld [vmem:[%s5128_s0 + $0x110] ss:$8 sps:$4 sm:$0xff]   ;;  %v3511_v29 = vld [vmem:[%s5128_s0 + $0x104] ss:$8 sps:$4 sm:$0xff]  }
  0x15   : > { %1162 = vmatpush1.bf16.msra.mxu0 %v3483_v10  ;;  %s3155_s9 = sshll.u32 %s3150_s19, 4  ;;  %v3513_v30 = vld [vmem:[%s5128_s0] ss:$8 sps:$4 sm:$0xff]   ;;  %v3515_v32 = vld [vmem:[%s5128_s0 + $0xf4] ss:$8 sps:$4 sm:$0xff]   ;;  %vm1609_vm0 = vcmask 556032  }
  0x16   : > { %1275 = vmatpush1.bf16.msra.mxu1 %v3484_v11  ;;  %1163 = vmatprep.subr.bf16.mxu0 %v3485_v12  ;;  %v3514_v31 = vld [vmem:[%s5128_s0 + $0x100] ss:$8 sps:$4 sm:$0xff]   ;;  %p252_p3 = scmp.lt.s32.totalorder %s3155_s9, 31  ;;  %v3517_v33 = vld [vmem:[%s5128_s0 + $0x1f4] ss:$8 sps:$4 sm:$0xff]  }
  0x17   : > { %1276 = vmatprep.subr.bf16.mxu1 %v3487_v13  ;;  %v3519_v34 = vld [vmem:[%s5128_s0 + $0xf0] ss:$8 sps:$4 sm:$0xff]   ;;  %v3521_v36 = vld [vmem:[%s5128_s0 + $0xe4] ss:$8 sps:$4 sm:$0xff]   ;;  %v3525_v38 = vld [vmem:[%s5128_s0 + $0xe0] ss:$8 sps:$4 sm:$0xff]  }
  0x18   : > { %v3520_v35 = vld [vmem:[%s5128_s0 + $0x1f0] ss:$8 sps:$4 sm:$0xff]   ;;  %s5141_s9 = smov (!%p252_p3, %s3155_s9), 31  ;;  %v3523_v37 = vld [vmem:[%s5128_s0 + $0x1e4] ss:$8 sps:$4 sm:$0xff]  }
  0x19   : > { %1164 = vmatpush1.bf16.msra.mxu0 %v3489_v14  ;;  %v3526_v39 = vld [vmem:[%s5128_s0 + $0x1e0] ss:$8 sps:$4 sm:$0xff]   ;;  %v3527_v40 = vld [vmem:[%s5128_s0 + $0xd4] ss:$8 sps:$4 sm:$0xff]   ;;  %s3455_s8 = smul.u32 24, %s5141_s9  ;;  %s3158_s7 = sshll.u32 %s5141_s9, 3 }
  0x1a   : > { %1277 = vmatpush1.bf16.msra.mxu1 %v3490_v15  ;;  %1165 = vmatprep.subr.bf16.mxu0 %v3491_v16  ;;  %v3529_v41 = vld [vmem:[%s5128_s0 + $0x1d4] ss:$8 sps:$4 sm:$0xff]   ;;  %v3531_v42 = vld [vmem:[%s5128_s0 + $0xd0] ss:$8 sps:$4 sm:$0xff]   ;;  %v3533_v44 = vld [vmem:[%s5128_s0 + $0xc4] ss:$8 sps:$4 sm:$0xff]   ;;  %s4540_s15 = scalar_lea.vmem %s5131_s3, %s3158_s7  ;;  %s4693_s19 = scalar_lea.vmem %s5132_s4, %s3158_s7 }
  0x1b   : > { %1278 = vmatprep.subr.bf16.mxu1 %v3493_v17  ;;  %v3532_v43 = vld [vmem:[%s5128_s0 + $0x1d0] ss:$8 sps:$4 sm:$0xff]   ;;  %s4029_s21 = scalar_lea.vmem %s5130_s2, %s3455_s8  ;;  %v3535_v45 = vld [vmem:[%s5128_s0 + $0x1c4] ss:$8 sps:$4 sm:$0xff]   ;;  %v3537_v46 = vld [vmem:[%s5128_s0 + $0xc0] ss:$8 sps:$4 sm:$0xff]  }
  0x1c   : > { %v3538_v47 = vld [vmem:[%s5128_s0 + $0x1c0] ss:$8 sps:$4 sm:$0xff]   ;;  %v3539_v48 = vld [vmem:[%s5128_s0 + $0xb4] ss:$8 sps:$4 sm:$0xff]   ;;  %v3568_v51 = vld [vmem:[%s4029_s21 + $0xc] ss:$24 sps:$4 sm:$0xff]  }
  0x1d   : > { %1166 = vmatpush1.bf16.msra.mxu0 %v3495_v18  ;;  %v4044_v49 = vld [vmem:[%s4029_s21 + $0x4] ss:$24 sps:$4 sm:$0xff]   ;;  %v3543_v52 = vld [vmem:[%s5128_s0 + $0xb0] ss:$8 sps:$4 sm:$0xff]   ;;  %1302 = vmatprep.mubr.bf16.mxu1 %v3568_v51  ;;  %v3549_v56 = vld [vmem:[%s5128_s0 + $0xa0] ss:$8 sps:$4 sm:$0xff]  }
  0x1e   : > { %1279 = vmatpush1.bf16.msra.mxu1 %v3496_v19  ;;  %1167 = vmatprep.subr.bf16.mxu0 %v3497_v20  ;;  %v3541_v50 = vld [vmem:[%s5128_s0 + $0x1b4] ss:$8 sps:$4 sm:$0xff]   ;;  %v3544_v53 = vld [vmem:[%s5128_s0 + $0x1b0] ss:$8 sps:$4 sm:$0xff]   ;;  %v3545_v54 = vld [vmem:[%s5128_s0 + $0xa4] ss:$8 sps:$4 sm:$0xff]  }
  0x1f   : > { %1280 = vmatprep.subr.bf16.mxu1 %v3499_v21  ;;  %1189 = vmatprep.mubr.bf16.mxu0 %v4044_v49  ;;  %v3547_v55 = vld [vmem:[%s5128_s0 + $0x1a4] ss:$8 sps:$4 sm:$0xff]   ;;  %v3550_v57 = vld [vmem:[%s5128_s0 + $0x1a0] ss:$8 sps:$4 sm:$0xff]   ;;  %v3551_v58 = vld [vmem:[%s5128_s0 + $0x94] ss:$8 sps:$4 sm:$0xff]  }
  0x20   : > { %v3553_v59 = vld [vmem:[%s5128_s0 + $0x194] ss:$8 sps:$4 sm:$0xff]   ;;  %v3555_v60 = vld [vmem:[%s5128_s0 + $0x90] ss:$8 sps:$4 sm:$0xff]   ;;  %v3557_v62 = vld [vmem:[%s5128_s0 + $0x84] ss:$8 sps:$4 sm:$0xff]  }
  0x21   : > { %1168 = vmatpush1.bf16.msra.mxu0 %v3501_v22  ;;  %v3556_v61 = vld [vmem:[%s5128_s0 + $0x190] ss:$8 sps:$4 sm:$0xff]   ;;  %v3559_v63 = vld [vmem:[%s5128_s0 + $0x184] ss:$8 sps:$4 sm:$0xff]   ;;  %v3561_v0 = vld [vmem:[%s5128_s0 + $0x80] ss:$8 sps:$4 sm:$0xff]  }
  0x22   : > { %1281 = vmatpush1.bf16.msra.mxu1 %v3502_v23  ;;  %1169 = vmatprep.subr.bf16.mxu0 %v3503_v24  ;;  %v3562_v1 = vld [vmem:[%s5128_s0 + $0x180] ss:$8 sps:$4 sm:$0xff]   ;;  %v3571_v2 = vld [vmem:[%s5128_s0 + $0x274] ss:$8 sps:$4 sm:$0xff]   ;;  %v3569_v6 = vld [vmem:[%s5128_s0 + $0x270] ss:$8 sps:$4 sm:$0xff]  }
  0x23   : > { %1282 = vmatprep.subr.bf16.mxu1 %v3505_v25  ;;  %v3574_v3 = vld [vmem:[%s5129_s1 + $0x74] ss:$8 sps:$4 sm:$0xff]   ;;  %v4100_v4 = vld [vmem:[%s4029_s21] ss:$24 sps:$4 sm:$0xff]   ;;  %v3577_v8 = vld [vmem:[%s5128_s0 + $0x264] ss:$8 sps:$4 sm:$0xff]  }
  0x24   : > { %v3566_v5 = vld [vmem:[%s4029_s21 + $0x8] ss:$24 sps:$4 sm:$0xff]   ;;  %v3572_v7 = vld [vmem:[%s5129_s1 + $0x70] ss:$8 sps:$4 sm:$0xff]   ;;  %v3580_v9 = vld [vmem:[%s5129_s1 + $0x64] ss:$8 sps:$4 sm:$0xff]  }
  0x25   : > { %1170 = vmatpush1.bf16.msra.mxu0 %v3507_v26  ;;  %v4116_v10 = vld [vmem:[%s4029_s21 + $0x34] ss:$24 sps:$4 sm:$0xff]   ;;  %v3575_v12 = vld [vmem:[%s5128_s0 + $0x260] ss:$8 sps:$4 sm:$0xff]   ;;  %v3586_v17 = vld [vmem:[%s4029_s21 + $0x38] ss:$24 sps:$4 sm:$0xff]  }
  0x26   : > { %1283 = vmatpush1.bf16.msra.mxu1 %v3508_v27  ;;  %1171 = vmatprep.subr.bf16.mxu0 %v3509_v28  ;;  %v3583_v11 = vld [vmem:[%s4029_s21 + $0x3c] ss:$24 sps:$4 sm:$0xff]   ;;  %v3578_v13 = vld [vmem:[%s5129_s1 + $0x60] ss:$8 sps:$4 sm:$0xff]   ;;  %v3587_v18 = vld [vmem:[%s5128_s0 + $0x250] ss:$8 sps:$4 sm:$0xff]  }
  0x27   : > { %1284 = vmatprep.subr.bf16.mxu1 %v3511_v29  ;;  %v3589_v14 = vld [vmem:[%s5128_s0 + $0x254] ss:$8 sps:$4 sm:$0xff]   ;;  %v4134_v16 = vld [vmem:[%s4029_s21 + $0x30] ss:$24 sps:$4 sm:$0xff]   ;;  %v3847_v20 = vmov 0  }
  0x28   : > { %v3592_v15 = vld [vmem:[%s5129_s1 + $0x54] ss:$8 sps:$4 sm:$0xff]   ;;  %v3590_v19 = vld [vmem:[%s5129_s1 + $0x50] ss:$8 sps:$4 sm:$0xff]   ;;  %3465 = vset.pattern.permute.xlu0 %v3847_v20  ;;  %3466 = vset.pattern.permute.xlu1 %v3847_v20  ;;  %v3595_v21 = vld [vmem:[%s5128_s0 + $0x244] ss:$8 sps:$4 sm:$0xff]  }
  0x29   : > { %1172 = vmatpush1.bf16.msra.mxu0 %v3513_v30  ;;  %v3598_v22 = vld [vmem:[%s5129_s1 + $0x44] ss:$8 sps:$4 sm:$0xff]   ;;  %v3593_v25 = vld [vmem:[%s5128_s0 + $0x240] ss:$8 sps:$4 sm:$0xff]   ;;  %v3607_v27 = vld [vmem:[%s5128_s0 + $0x234] ss:$8 sps:$4 sm:$0xff]  }
  0x2a   : > { %1285 = vmatpush1.bf16.msra.mxu1 %v3514_v31  ;;  %1173 = vmatprep.subr.bf16.mxu0 %v3515_v32  ;;  %v4150_v23 = vld [vmem:[%s4029_s21 + $0x64] ss:$24 sps:$4 sm:$0xff]   ;;  %v3596_v26 = vld [vmem:[%s5129_s1 + $0x40] ss:$8 sps:$4 sm:$0xff]   ;;  %v3605_v31 = vld [vmem:[%s5128_s0 + $0x230] ss:$8 sps:$4 sm:$0xff]  }
  0x2b   : > { %1286 = vmatprep.subr.bf16.mxu1 %v3517_v33  ;;  %v3601_v24 = vld [vmem:[%s4029_s21 + $0x6c] ss:$24 sps:$4 sm:$0xff]   ;;  %v3610_v28 = vld [vmem:[%s5129_s1 + $0x34] ss:$8 sps:$4 sm:$0xff]   ;;  %v4168_v29 = vld [vmem:[%s4029_s21 + $0x60] ss:$24 sps:$4 sm:$0xff]  }
  0x2c   : > { %v3604_v30 = vld [vmem:[%s4029_s21 + $0x68] ss:$24 sps:$4 sm:$0xff]   ;;  %v3608_v32 = vld [vmem:[%s5129_s1 + $0x30] ss:$8 sps:$4 sm:$0xff]   ;;  %v3613_v33 = vld [vmem:[%s5128_s0 + $0x224] ss:$8 sps:$4 sm:$0xff]  }
  0x2d   : > { %1174 = vmatpush2.bf16.msra.mxu0 %v3519_v34  ;;  %v3616_v34 = vld [vmem:[%s5129_s1 + $0x24] ss:$8 sps:$4 sm:$0xff]   ;;  %v3632_v51 = vld [vmem:[%s5129_s1] ss:$8 sps:$4 sm:$0xff]   ;;  %v3680_v20 = vld [vmem:[%s5129_s1 + $0xb0] ss:$8 sps:$4 sm:$0xff]  }
  0x2e   : > { %1287 = vmatpush2.bf16.msra.mxu1 %v3520_v35  ;;  %1175 = vmatprep.subr.bf16.mxu0 %v3521_v36  ;;  %v4184_v35 = vld [vmem:[%s4029_s21 + $0x94] ss:$24 sps:$4 sm:$0xff]  }
  0x2f   : > { %1288 = vmatprep.subr.bf16.mxu1 %v3523_v37  ;;  %v3619_v36 = vld [vmem:[%s4029_s21 + $0x9c] ss:$24 sps:$4 sm:$0xff]   ;;  %v3611_v37 = vld [vmem:[%s5128_s0 + $0x220] ss:$8 sps:$4 sm:$0xff]  }
  0x31   : > { %1176 = vmatpush2.bf16.msra.mxu0 %v3525_v38  ;;  %v3614_v38 = vld [vmem:[%s5129_s1 + $0x20] ss:$8 sps:$4 sm:$0xff]  }
  0x32   : > { %1289 = vmatpush2.bf16.msra.mxu1 %v3526_v39  ;;  %1177 = vmatprep.subr.bf16.mxu0 %v3527_v40  ;;  %v3625_v39 = vld [vmem:[%s5128_s0 + $0x214] ss:$8 sps:$4 sm:$0xff]  }
  0x33   : > { %1290 = vmatprep.subr.bf16.mxu1 %v3529_v41  ;;  %v3628_v40 = vld [vmem:[%s5129_s1 + $0x14] ss:$8 sps:$4 sm:$0xff]   ;;  %v4202_v41 = vld [vmem:[%s4029_s21 + $0x90] ss:$24 sps:$4 sm:$0xff]  }
  0x35   : > { %1178 = vmatpush2.bf16.msra.mxu0 %v3531_v42  ;;  %v3622_v42 = vld [vmem:[%s4029_s21 + $0x98] ss:$24 sps:$4 sm:$0xff]  }
  0x36   : > { %1291 = vmatpush2.bf16.msra.mxu1 %v3532_v43  ;;  %1179 = vmatprep.subr.bf16.mxu0 %v3533_v44  ;;  %v3623_v43 = vld [vmem:[%s5128_s0 + $0x210] ss:$8 sps:$4 sm:$0xff]  }
  0x37   : > { %1292 = vmatprep.subr.bf16.mxu1 %v3535_v45  ;;  %v3626_v44 = vld [vmem:[%s5129_s1 + $0x10] ss:$8 sps:$4 sm:$0xff]   ;;  %v3631_v45 = vld [vmem:[%s5128_s0 + $0x204] ss:$8 sps:$4 sm:$0xff]  }
  0x39   : > { %1180 = vmatpush2.bf16.msra.mxu0 %v3537_v46  ;;  %v3634_v46 = vld [vmem:[%s5129_s1 + $0x4] ss:$8 sps:$4 sm:$0xff]  }
  0x3a   : > { %1293 = vmatpush2.bf16.msra.mxu1 %v3538_v47  ;;  %1181 = vmatprep.subr.bf16.mxu0 %v3539_v48  ;;  %v4218_v47 = vld [vmem:[%s4029_s21 + $0xc4] ss:$24 sps:$4 sm:$0xff]  }
  0x3b   : > { %1294 = vmatprep.subr.bf16.mxu1 %v3541_v50  ;;  %v4221_v48 = vld [vmem:[%s4029_s21 + $0xcc] ss:$24 sps:$4 sm:$0xff]   ;;  %v3629_v50 = vld [vmem:[%s5128_s0 + $0x200] ss:$8 sps:$4 sm:$0xff]  }
  0x3d   : > { %1182 = vmatpush2.bf16.msra.mxu0 %v3543_v52  ;;  %v3643_v52 = vld [vmem:[%s5128_s0 + $0x2f4] ss:$8 sps:$4 sm:$0xff]  }
  0x3e   : > { %1295 = vmatpush2.bf16.msra.mxu1 %v3544_v53  ;;  %1183 = vmatprep.subr.bf16.mxu0 %v3545_v54  ;;  %v3646_v53 = vld [vmem:[%s5129_s1 + $0xf4] ss:$8 sps:$4 sm:$0xff]   ;;  %v4239_v54 = vld [vmem:[%s4029_s21 + $0xc0] ss:$24 sps:$4 sm:$0xff]  }
  0x3f   : > { %1296 = vmatprep.subr.bf16.mxu1 %v3547_v55  ;;  %v4242_v55 = vld [vmem:[%s4029_s21 + $0xc8] ss:$24 sps:$4 sm:$0xff]  }
  0x41   : > { %1184 = vmatpush2.bf16.msra.mxu0 %v3549_v56  ;;  %v3641_v56 = vld [vmem:[%s5128_s0 + $0x2f0] ss:$8 sps:$4 sm:$0xff]  }
  0x42   : > { %1297 = vmatpush2.bf16.msra.mxu1 %v3550_v57  ;;  %1185 = vmatprep.subr.bf16.mxu0 %v3551_v58  ;;  %v3644_v57 = vld [vmem:[%s5129_s1 + $0xf0] ss:$8 sps:$4 sm:$0xff]   ;;  %v3649_v58 = vld [vmem:[%s5128_s0 + $0x2e4] ss:$8 sps:$4 sm:$0xff]  }
  0x43   : > { %1298 = vmatprep.subr.bf16.mxu1 %v3553_v59  ;;  %v3652_v59 = vld [vmem:[%s5129_s1 + $0xe4] ss:$8 sps:$4 sm:$0xff]  }
  0x45   : > { %1186 = vmatpush2.bf16.msra.mxu0 %v3555_v60  ;;  %v4257_v60 = vld [vmem:[%s4029_s21 + $0xf4] ss:$24 sps:$4 sm:$0xff]  }
  0x46   : > { %1299 = vmatpush2.bf16.msra.mxu1 %v3556_v61  ;;  %1187 = vmatprep.subr.bf16.mxu0 %v3557_v62  ;;  %v4260_v61 = vld [vmem:[%s4029_s21 + $0xfc] ss:$24 sps:$4 sm:$0xff]   ;;  %v3647_v62 = vld [vmem:[%s5128_s0 + $0x2e0] ss:$8 sps:$4 sm:$0xff]  }
  0x47   : > { %1300 = vmatprep.subr.bf16.mxu1 %v3559_v63  ;;  %v3650_v63 = vld [vmem:[%s5129_s1 + $0xe0] ss:$8 sps:$4 sm:$0xff]  }
  0x49   : > { %1188 = vmatpush2.bf16.msra.mxu0 %v3561_v0  ;;  %v3661_v0 = vld [vmem:[%s5128_s0 + $0x2d4] ss:$8 sps:$4 sm:$0xff]  }
  0x4a   : > { %1301 = vmatpush2.bf16.msra.mxu1 %v3562_v1  ;;  %1383 = vmatprep.subr.bf16.mxu0 %v3571_v2  ;;  %v3664_v1 = vld [vmem:[%s5129_s1 + $0xd4] ss:$8 sps:$4 sm:$0xff]   ;;  %v4279_v2 = vld [vmem:[%s4029_s21 + $0xf0] ss:$24 sps:$4 sm:$0xff]  }
  0x4b   : > { %2553 = vmatprep.subr.bf16.mxu1 %v3574_v3  ;;  %v4282_v3 = vld [vmem:[%s4029_s21 + $0xf8] ss:$24 sps:$4 sm:$0xff]  }
  0x4c   : > { %1190 = vmatmul.mubr.bf16.vlgmr.msra.gmra.mxu0 %v4100_v4 }
  0x4d   : > { %1303 = vmatmul.mubr.bf16.vlgmr.msra.gmra.mxu1 %v3566_v5  ;;  %1384 = vmatpush1.bf16.msra.mxu0 %v3569_v6  ;;  %v3659_v5 = vld [vmem:[%s5128_s0 + $0x2d0] ss:$8 sps:$4 sm:$0xff]  }
  0x4e   : > { %2554 = vmatpush1.bf16.msra.mxu1 %v3572_v7  ;;  %1385 = vmatprep.subr.bf16.mxu0 %v3577_v8  ;;  %v3662_v6 = vld [vmem:[%s5129_s1 + $0xd0] ss:$8 sps:$4 sm:$0xff]   ;;  %v3667_v7 = vld [vmem:[%s5128_s0 + $0x2c4] ss:$8 sps:$4 sm:$0xff]  }
  0x4f   : > { %2555 = vmatprep.subr.bf16.mxu1 %v3580_v9  ;;  %1199 = vmatprep.mubr.bf16.mxu0 %v4116_v10  ;;  %v3670_v8 = vld [vmem:[%s5129_s1 + $0xc4] ss:$8 sps:$4 sm:$0xff]  }
  0x50   : > { %1312 = vmatprep.mubr.bf16.mxu1 %v3583_v11  ;;  %v4297_v9 = vld [vmem:[%s4029_s21 + $0x124] ss:$24 sps:$4 sm:$0xff]  }
  0x51   : > { %1386 = vmatpush1.bf16.msra.mxu0 %v3575_v12  ;;  %v4300_v11 = vld [vmem:[%s4029_s21 + $0x12c] ss:$24 sps:$4 sm:$0xff]   ;;  %v3665_v12 = vld [vmem:[%s5128_s0 + $0x2c0] ss:$8 sps:$4 sm:$0xff]  }
  0x52   : > { %2556 = vmatpush1.bf16.msra.mxu1 %v3578_v13  ;;  %1387 = vmatprep.subr.bf16.mxu0 %v3589_v14  ;;  %v3668_v13 = vld [vmem:[%s5129_s1 + $0xc0] ss:$8 sps:$4 sm:$0xff]   ;;  %v3679_v14 = vld [vmem:[%s5128_s0 + $0x2b4] ss:$8 sps:$4 sm:$0xff]  }
  0x53   : > { %2557 = vmatprep.subr.bf16.mxu1 %v3592_v15  ;;  %v3682_v15 = vld [vmem:[%s5129_s1 + $0xb4] ss:$8 sps:$4 sm:$0xff]  }
  0x54   : > { %1200 = vmatmul.mubr.bf16.gmra.mxu0 %v4134_v16 }
  0x55   : > { %1313 = vmatmul.mubr.bf16.gmra.mxu1 %v3586_v17  ;;  %1388 = vmatpush1.bf16.msra.mxu0 %v3587_v18  ;;  %v4319_v17 = vld [vmem:[%s4029_s21 + $0x120] ss:$24 sps:$4 sm:$0xff]  }
  0x56   : > { %2558 = vmatpush1.bf16.msra.mxu1 %v3590_v19  ;;  %1389 = vmatprep.subr.bf16.mxu0 %v3595_v21  ;;  %v4322_v18 = vld [vmem:[%s4029_s21 + $0x128] ss:$24 sps:$4 sm:$0xff]   ;;  %v3677_v19 = vld [vmem:[%s5128_s0 + $0x2b0] ss:$8 sps:$4 sm:$0xff]   ;;  %v3685_v21 = vld [vmem:[%s5128_s0 + $0x2a4] ss:$8 sps:$4 sm:$0xff]  }
  0x57   : > { %2559 = vmatprep.subr.bf16.mxu1 %v3598_v22  ;;  %1209 = vmatprep.mubr.bf16.mxu0 %v4150_v23  ;;  %v3688_v22 = vld [vmem:[%s5129_s1 + $0xa4] ss:$8 sps:$4 sm:$0xff]  }
  0x58   : > { %1322 = vmatprep.mubr.bf16.mxu1 %v3601_v24  ;;  %v4337_v24 = vld [vmem:[%s4029_s21 + $0x154] ss:$24 sps:$4 sm:$0xff]  }
  0x59   : > { %1390 = vmatpush1.bf16.msra.mxu0 %v3593_v25  ;;  %v4340_v25 = vld [vmem:[%s4029_s21 + $0x15c] ss:$24 sps:$4 sm:$0xff]  }
  0x5a   : > { %2560 = vmatpush1.bf16.msra.mxu1 %v3596_v26  ;;  %1391 = vmatprep.subr.bf16.mxu0 %v3607_v27  ;;  %v3683_v26 = vld [vmem:[%s5128_s0 + $0x2a0] ss:$8 sps:$4 sm:$0xff]  }
  0x5b   : > { %2561 = vmatprep.subr.bf16.mxu1 %v3610_v28  ;;  %v3686_v27 = vld [vmem:[%s5129_s1 + $0xa0] ss:$8 sps:$4 sm:$0xff]   ;;  %v3697_v28 = vld [vmem:[%s5128_s0 + $0x294] ss:$8 sps:$4 sm:$0xff]  }
  0x5c   : > { %1210 = vmatmul.mubr.bf16.gmra.mxu0 %v4168_v29 }
  0x5d   : > { %1323 = vmatmul.mubr.bf16.gmra.mxu1 %v3604_v30  ;;  %1392 = vmatpush1.bf16.msra.mxu0 %v3605_v31  ;;  %v3700_v30 = vld [vmem:[%s5129_s1 + $0x94] ss:$8 sps:$4 sm:$0xff]   ;;  %v4359_v31 = vld [vmem:[%s4029_s21 + $0x150] ss:$24 sps:$4 sm:$0xff]  }
  0x5e   : > { %2562 = vmatpush1.bf16.msra.mxu1 %v3608_v32  ;;  %1393 = vmatprep.subr.bf16.mxu0 %v3613_v33  ;;  %v4362_v32 = vld [vmem:[%s4029_s21 + $0x158] ss:$24 sps:$4 sm:$0xff]  }
  0x5f   : > { %2563 = vmatprep.subr.bf16.mxu1 %v3616_v34  ;;  %1219 = vmatprep.mubr.bf16.mxu0 %v4184_v35  ;;  %v3695_v33 = vld [vmem:[%s5128_s0 + $0x290] ss:$8 sps:$4 sm:$0xff]  }
  0x60   : > { %1332 = vmatprep.mubr.bf16.mxu1 %v3619_v36  ;;  %v3698_v34 = vld [vmem:[%s5129_s1 + $0x90] ss:$8 sps:$4 sm:$0xff]   ;;  %v3703_v36 = vld [vmem:[%s5128_s0 + $0x284] ss:$8 sps:$4 sm:$0xff]  }
  0x61   : > { %1394 = vmatpush1.bf16.msra.mxu0 %v3611_v37  ;;  %v3706_v37 = vld [vmem:[%s5129_s1 + $0x84] ss:$8 sps:$4 sm:$0xff]  }
  0x62   : > { %2564 = vmatpush1.bf16.msra.mxu1 %v3614_v38  ;;  %1395 = vmatprep.subr.bf16.mxu0 %v3625_v39  ;;  %v4377_v38 = vld [vmem:[%s4029_s21 + $0x14] ss:$24 sps:$4 sm:$0xff]   ;;  %v3701_v39 = vld [vmem:[%s5128_s0 + $0x280] ss:$8 sps:$4 sm:$0xff]  }
  0x63   : > { %2565 = vmatprep.subr.bf16.mxu1 %v3628_v40  ;;  %v3704_v40 = vld [vmem:[%s5129_s1 + $0x80] ss:$8 sps:$4 sm:$0xff]  }
  0x64   : > { %1220 = vmatmul.mubr.bf16.gmra.mxu0 %v4202_v41 }
  0x65   : > { %1333 = vmatmul.mubr.bf16.gmra.mxu1 %v3622_v42  ;;  %1396 = vmatpush1.bf16.msra.mxu0 %v3623_v43  ;;  %v3712_v42 = vld [vmem:[%s5129_s1 + $0x174] ss:$8 sps:$4 sm:$0xff]  }
  0x66   : > { %2566 = vmatpush1.bf16.msra.mxu1 %v3626_v44  ;;  %1397 = vmatprep.subr.bf16.mxu0 %v3631_v45  ;;  %v3715_v43 = vld [vmem:[%s5129_s1 + $0x274] ss:$8 sps:$4 sm:$0xff]   ;;  %v4394_v44 = vld [vmem:[%s4029_s21 + $0x10] ss:$24 sps:$4 sm:$0xff]  }
  0x67   : > { %2567 = vmatprep.subr.bf16.mxu1 %v3634_v46  ;;  %1229 = vmatprep.mubr.bf16.mxu0 %v4218_v47  ;;  %v3710_v45 = vld [vmem:[%s5129_s1 + $0x170] ss:$8 sps:$4 sm:$0xff]  }
  0x68   : > { %1342 = vmatprep.mubr.bf16.mxu1 %v4221_v48  ;;  %v3713_v46 = vld [vmem:[%s5129_s1 + $0x270] ss:$8 sps:$4 sm:$0xff]  }
  0x69   : > { %1398 = vmatpush1.bf16.msra.mxu0 %v3629_v50  ;;  %v3718_v50 = vld [vmem:[%s5129_s1 + $0x164] ss:$8 sps:$4 sm:$0xff]  }
  0x6a   : > { %2568 = vmatpush1.bf16.msra.mxu1 %v3632_v51  ;;  %1399 = vmatprep.subr.bf16.mxu0 %v3643_v52  ;;  %v4411_v51 = vld [vmem:[%s4029_s21 + $0x44] ss:$24 sps:$4 sm:$0xff]   ;;  %v3716_v52 = vld [vmem:[%s5129_s1 + $0x160] ss:$8 sps:$4 sm:$0xff]  }
  0x6b   : > { %2569 = vmatprep.subr.bf16.mxu1 %v3646_v53  ;;  %v3719_v53 = vld [vmem:[%s5129_s1 + $0x260] ss:$8 sps:$4 sm:$0xff]  }
  0x6c   : > { %1230 = vmatmul.mubr.bf16.gmra.mxu0 %v4239_v54 }
  0x6d   : > { %1343 = vmatmul.mubr.bf16.gmra.mxu1 %v4242_v55  ;;  %1400 = vmatpush2.bf16.msra.mxu0 %v3641_v56  ;;  %v3727_v56 = vld [vmem:[%s5129_s1 + $0x154] ss:$8 sps:$4 sm:$0xff]  }
  0x6e   : > { %2570 = vmatpush2.bf16.msra.mxu1 %v3644_v57  ;;  %1401 = vmatprep.subr.bf16.mxu0 %v3649_v58  ;;  %v4430_v57 = vld [vmem:[%s4029_s21 + $0x40] ss:$24 sps:$4 sm:$0xff]  }
  0x6f   : > { %2571 = vmatprep.subr.bf16.mxu1 %v3652_v59  ;;  %1239 = vmatprep.mubr.bf16.mxu0 %v4257_v60  ;;  %v3725_v58 = vld [vmem:[%s5129_s1 + $0x150] ss:$8 sps:$4 sm:$0xff]  }
  0x70   : > { %1352 = vmatprep.mubr.bf16.mxu1 %v4260_v61  ;;  %v3728_v59 = vld [vmem:[%s5129_s1 + $0x250] ss:$8 sps:$4 sm:$0xff]  }
  0x71   : > { %1402 = vmatpush2.bf16.msra.mxu0 %v3647_v62  ;;  %v3733_v62 = vld [vmem:[%s5129_s1 + $0x144] ss:$8 sps:$4 sm:$0xff]  }
  0x72   : > { %2572 = vmatpush2.bf16.msra.mxu1 %v3650_v63  ;;  %1403 = vmatprep.subr.bf16.mxu0 %v3661_v0  ;;  %v4445_v63 = vld [vmem:[%s4029_s21 + $0x74] ss:$24 sps:$4 sm:$0xff]   ;;  %v3731_v0 = vld [vmem:[%s5129_s1 + $0x140] ss:$8 sps:$4 sm:$0xff]  }
  0x73   : > { %2573 = vmatprep.subr.bf16.mxu1 %v3664_v1  ;;  %v3734_v1 = vld [vmem:[%s5129_s1 + $0x240] ss:$8 sps:$4 sm:$0xff]  }
  0x74   : > { %1240 = vmatmul.mubr.bf16.gmra.mxu0 %v4279_v2 }
  0x75   : > { %1353 = vmatmul.mubr.bf16.gmra.mxu1 %v4282_v3  ;;  %1404 = vmatpush2.bf16.msra.mxu0 %v3659_v5  ;;  %v3742_v5 = vld [vmem:[%s5129_s1 + $0x134] ss:$8 sps:$4 sm:$0xff]  }
  0x76   : > { %2574 = vmatpush2.bf16.msra.mxu1 %v3662_v6  ;;  %1405 = vmatprep.subr.bf16.mxu0 %v3667_v7  ;;  %v4464_v6 = vld [vmem:[%s4029_s21 + $0x70] ss:$24 sps:$4 sm:$0xff]  }
  0x77   : > { %2575 = vmatprep.subr.bf16.mxu1 %v3670_v8  ;;  %1249 = vmatprep.mubr.bf16.mxu0 %v4297_v9  ;;  %v3740_v7 = vld [vmem:[%s5129_s1 + $0x130] ss:$8 sps:$4 sm:$0xff]  }
  0x78   : > { %1362 = vmatprep.mubr.bf16.mxu1 %v4300_v11  ;;  %v3743_v8 = vld [vmem:[%s5129_s1 + $0x230] ss:$8 sps:$4 sm:$0xff]  }
  0x79   : > { %1406 = vmatpush2.bf16.msra.mxu0 %v3665_v12  ;;  %v3748_v12 = vld [vmem:[%s5129_s1 + $0x124] ss:$8 sps:$4 sm:$0xff]  }
  0x7a   : > { %2576 = vmatpush2.bf16.msra.mxu1 %v3668_v13  ;;  %1407 = vmatprep.subr.bf16.mxu0 %v3679_v14  ;;  %v4479_v13 = vld [vmem:[%s4029_s21 + $0xa4] ss:$24 sps:$4 sm:$0xff]   ;;  %v3746_v14 = vld [vmem:[%s5129_s1 + $0x120] ss:$8 sps:$4 sm:$0xff]  }
  0x7b   : > { %2577 = vmatprep.subr.bf16.mxu1 %v3682_v15  ;;  %v3749_v15 = vld [vmem:[%s5129_s1 + $0x220] ss:$8 sps:$4 sm:$0xff]  }
  0x7c   : > { %1250 = vmatmul.mubr.bf16.gmra.mxu0 %v4319_v17 }
  0x7d   : > { %1363 = vmatmul.mubr.bf16.gmra.mxu1 %v4322_v18  ;;  %1408 = vmatpush2.bf16.msra.mxu0 %v3677_v19  ;;  %v3757_v19 = vld [vmem:[%s5129_s1 + $0x114] ss:$8 sps:$4 sm:$0xff]  }
  0x7e   : > { %2578 = vmatpush2.bf16.msra.mxu1 %v3680_v20  ;;  %1409 = vmatprep.subr.bf16.mxu0 %v3685_v21  ;;  %v4498_v20 = vld [vmem:[%s4029_s21 + $0xa0] ss:$24 sps:$4 sm:$0xff]  }
  0x7f   : > { %2579 = vmatprep.subr.bf16.mxu1 %v3688_v22  ;;  %1259 = vmatprep.mubr.bf16.mxu0 %v4337_v24  ;;  %v3755_v21 = vld [vmem:[%s5129_s1 + $0x110] ss:$8 sps:$4 sm:$0xff]  }
  0x80   : > { %1372 = vmatprep.mubr.bf16.mxu1 %v4340_v25  ;;  %v3758_v22 = vld [vmem:[%s5129_s1 + $0x210] ss:$8 sps:$4 sm:$0xff]  }
  0x81   : > { %1410 = vmatpush2.bf16.msra.mxu0 %v3683_v26  ;;  %v3763_v26 = vld [vmem:[%s5129_s1 + $0x104] ss:$8 sps:$4 sm:$0xff]  }
  0x82   : > { %2580 = vmatpush2.bf16.msra.mxu1 %v3686_v27  ;;  %1411 = vmatprep.subr.bf16.mxu0 %v3697_v28  ;;  %v4513_v27 = vld [vmem:[%s4029_s21 + $0xd4] ss:$24 sps:$4 sm:$0xff]   ;;  %v3761_v28 = vld [vmem:[%s5129_s1 + $0x100] ss:$8 sps:$4 sm:$0xff]  }
  0x83   : > { %2581 = vmatprep.subr.bf16.mxu1 %v3700_v30  ;;  %v3764_v30 = vld [vmem:[%s5129_s1 + $0x200] ss:$8 sps:$4 sm:$0xff]  }
  0x84   : > { %1260 = vmatmul.mubr.bf16.gmra.mxu0 %v4359_v31 }
  0x85   : > { %1373 = vmatmul.mubr.bf16.gmra.mxu1 %v4362_v32  ;;  %1412 = vmatpush2.bf16.msra.mxu0 %v3695_v33  ;;  %v3772_v33 = vld [vmem:[%s5129_s1 + $0x1f4] ss:$8 sps:$4 sm:$0xff]  }
  0x86   : > { %2582 = vmatpush2.bf16.msra.mxu1 %v3698_v34  ;;  %1413 = vmatprep.subr.bf16.mxu0 %v3703_v36  ;;  %v4533_v34 = vld [vmem:[%s4029_s21 + $0xd0] ss:$24 sps:$4 sm:$0xff]  }
  0x87   : > { %2583 = vmatprep.subr.bf16.mxu1 %v3706_v37  ;;  %1415 = vmatprep.mubr.bf16.mxu0 %v4377_v38  ;;  %v3770_v36 = vld [vmem:[%s5129_s1 + $0x1f0] ss:$8 sps:$4 sm:$0xff]  }
  0x88   : > { %2585 = vmatprep.mubr.bf16.mxu1 %v4044_v49  ;;  %v3721_v49 = vld [vmem:[%s5129_s1 + $0x264] ss:$8 sps:$4 sm:$0xff]   ;;  %v3773_v37 = vld [vmem:[%s5129_s1 + $0x2f0] ss:$8 sps:$4 sm:$0xff]  }
  0x89   : > { %1414 = vmatpush2.bf16.msra.mxu0 %v3701_v39  ;;  %v3781_v39 = vld [vmem:[%s5129_s1 + $0x2e4] ss:$8 sps:$4 sm:$0xff]  }
  0x8a   : > { %2584 = vmatpush2.bf16.msra.mxu1 %v3704_v40  ;;  %2666 = vmatprep.subr.bf16.mxu0 %v3712_v42  ;;  %v277_v40 = vld [vmem:[%s4540_s15] sm:$0xff] }
  0x8b   : > { %2779 = vmatprep.subr.bf16.mxu1 %v3715_v43  ;;  %v4556_v42 = vld [vmem:[%s4029_s21 + $0x104] ss:$24 sps:$4 sm:$0xff]   ;;  %1498 = vperm.xlu0 %3465, %v277_v40   ;;  %v3776_v43 = vld [vmem:[%s5129_s1 + $0x1e0] ss:$8 sps:$4 sm:$0xff]  }
  0x8c   : > { %1416 = vmatmul.mubr.bf16.vlgmr.msra.gmra.mxu0 %v4394_v44  ;;  %v289_v40 = vld [vmem:[%s4540_s15 + $0x60] sm:$0xff] }
  0x8d   : > { %2586 = vmatmul.mubr.bf16.vlgmr.msra.gmra.mxu1 %v4100_v4  ;;  %2667 = vmatpush1.bf16.msra.mxu0 %v3710_v45  ;;  %v3730_v4 = vld [vmem:[%s5129_s1 + $0x254] ss:$8 sps:$4 sm:$0xff]   ;;  %v3779_v45 = vld [vmem:[%s5129_s1 + $0x2e0] ss:$8 sps:$4 sm:$0xff]  }
  0x8e   : > { %2780 = vmatpush1.bf16.msra.mxu1 %v3713_v46  ;;  %2668 = vmatprep.subr.bf16.mxu0 %v3718_v50  ;;  %v278_v46 = vld [vmem:[%s4540_s15 + $0x8] sm:$0xff]  ;;  %v279_v50 = vld [vmem:[%s4540_s15 + $0x10] sm:$0xff] }
  0x8f   : > { %2781 = vmatprep.subr.bf16.mxu1 %v3721_v49  ;;  %1425 = vmatprep.mubr.bf16.mxu0 %v4411_v51  ;;  %v3787_v49 = vld [vmem:[%s5129_s1 + $0x1d4] ss:$8 sps:$4 sm:$0xff]  }
  0x90   : > { %2595 = vmatprep.mubr.bf16.mxu1 %v4116_v10  ;;  %v3736_v10 = vld [vmem:[%s5129_s1 + $0x244] ss:$8 sps:$4 sm:$0xff]   ;;  %1503 = vperm.xlu0 %3465, %v278_v46  }
  0x91   : > { %2669 = vmatpush1.bf16.msra.mxu0 %v3716_v52  ;;  %v4577_v52 = vld [vmem:[%s4029_s21 + $0x100] ss:$24 sps:$4 sm:$0xff]   ;;  %1508 = vperm.xlu1 %3466, %v279_v50   ;;  %v290_v46 = vld [vmem:[%s4540_s15 + $0x68] sm:$0xff]  ;;  %v291_v50 = vld [vmem:[%s4540_s15 + $0x70] sm:$0xff] }
  0x92   : > { %2782 = vmatpush1.bf16.msra.mxu1 %v3719_v53  ;;  %2670 = vmatprep.subr.bf16.mxu0 %v3727_v56  ;;  %v3785_v53 = vld [vmem:[%s5129_s1 + $0x1d0] ss:$8 sps:$4 sm:$0xff]  }
  0x93   : > { %2783 = vmatprep.subr.bf16.mxu1 %v3730_v4  ;;  %v3788_v56 = vld [vmem:[%s5129_s1 + $0x2d0] ss:$8 sps:$4 sm:$0xff]   ;;  %v3796_v4 = vld [vmem:[%s5129_s1 + $0x2c4] ss:$8 sps:$4 sm:$0xff]  }
  0x94   : > { %1426 = vmatmul.mubr.bf16.gmra.mxu0 %v4430_v57 }
  0x95   : > { %2596 = vmatmul.mubr.bf16.gmra.mxu1 %v4134_v16  ;;  %2671 = vmatpush1.bf16.msra.mxu0 %v3725_v58  ;;  %v3745_v16 = vld [vmem:[%s5129_s1 + $0x234] ss:$8 sps:$4 sm:$0xff]  }
  0x96   : > { %2784 = vmatpush1.bf16.msra.mxu1 %v3728_v59  ;;  %2672 = vmatprep.subr.bf16.mxu0 %v3733_v62  ;;  %v4592_v58 = vld [vmem:[%s4029_s21 + $0x134] ss:$24 sps:$4 sm:$0xff]   ;;  %v3791_v59 = vld [vmem:[%s5129_s1 + $0x1c0] ss:$8 sps:$4 sm:$0xff]  }
  0x97   : > { %2785 = vmatprep.subr.bf16.mxu1 %v3736_v10  ;;  %1435 = vmatprep.mubr.bf16.mxu0 %v4445_v63  ;;  %v3794_v62 = vld [vmem:[%s5129_s1 + $0x2c0] ss:$8 sps:$4 sm:$0xff]   ;;  %v280_v10 = vld [vmem:[%s4540_s15 + $0x18] sm:$0xff] }
  0x98   : > { %2605 = vmatprep.mubr.bf16.mxu1 %v4150_v23  ;;  %v3751_v23 = vld [vmem:[%s5129_s1 + $0x224] ss:$8 sps:$4 sm:$0xff]   ;;  %1513 = vperm.xlu1 %3466, %v280_v10   ;;  %v1683_v10 = vld [vmem:[%s4693_s19 + $0x50] sm:$0xff] }
  0x99   : > { %2673 = vmatpush1.bf16.msra.mxu0 %v3731_v0  ;;  %v281_v0 = vld [vmem:[%s4540_s15 + $0x20] sm:$0xff] }
  0x9a   : > { %2786 = vmatpush1.bf16.msra.mxu1 %v3734_v1  ;;  %2674 = vmatprep.subr.bf16.mxu0 %v3742_v5  ;;  %v3802_v1 = vld [vmem:[%s5129_s1 + $0x1b4] ss:$8 sps:$4 sm:$0xff]   ;;  %v4613_v5 = vld [vmem:[%s4029_s21 + $0x130] ss:$24 sps:$4 sm:$0xff]  }
  0x9b   : > { %2787 = vmatprep.subr.bf16.mxu1 %v3745_v16  ;;  %1518 = vperm.xlu0 %3465, %v281_v0   ;;  %v3800_v16 = vld [vmem:[%s5129_s1 + $0x1b0] ss:$8 sps:$4 sm:$0xff]  }
  0x9c   : > { %1436 = vmatmul.mubr.bf16.gmra.mxu0 %v4464_v6  ;;  %v1687_v0 = vld [vmem:[%s4693_s19 + $0x70] sm:$0xff] }
  0x9d   : > { %2606 = vmatmul.mubr.bf16.gmra.mxu1 %v4168_v29  ;;  %2675 = vmatpush1.bf16.msra.mxu0 %v3740_v7  ;;  %v3760_v29 = vld [vmem:[%s5129_s1 + $0x214] ss:$8 sps:$4 sm:$0xff]   ;;  %v3803_v7 = vld [vmem:[%s5129_s1 + $0x2b0] ss:$8 sps:$4 sm:$0xff]  }
  0x9e   : > { %2788 = vmatpush1.bf16.msra.mxu1 %v3743_v8  ;;  %2676 = vmatprep.subr.bf16.mxu0 %v3748_v12  ;;  %v3811_v8 = vld [vmem:[%s5129_s1 + $0x2a4] ss:$8 sps:$4 sm:$0xff]  }
  0x9f   : > { %2789 = vmatprep.subr.bf16.mxu1 %v3751_v23  ;;  %1445 = vmatprep.mubr.bf16.mxu0 %v4479_v13  ;;  %v4628_v12 = vld [vmem:[%s4029_s21 + $0x164] ss:$24 sps:$4 sm:$0xff]   ;;  %v3806_v23 = vld [vmem:[%s5129_s1 + $0x1a0] ss:$8 sps:$4 sm:$0xff]  }
  0xa0   : > { %2615 = vmatprep.mubr.bf16.mxu1 %v4184_v35  ;;  %v3766_v35 = vld [vmem:[%s5129_s1 + $0x204] ss:$8 sps:$4 sm:$0xff]  }
  0xa1   : > { %2677 = vmatpush1.bf16.msra.mxu0 %v3746_v14  ;;  %v3809_v14 = vld [vmem:[%s5129_s1 + $0x2a0] ss:$8 sps:$4 sm:$0xff]  }
  0xa2   : > { %2790 = vmatpush1.bf16.msra.mxu1 %v3749_v15  ;;  %2678 = vmatprep.subr.bf16.mxu0 %v3757_v19  ;;  %v282_v15 = vld [vmem:[%s4540_s15 + $0x28] sm:$0xff]  ;;  %v283_v19 = vld [vmem:[%s4540_s15 + $0x30] sm:$0xff] }
  0xa3   : > { %2791 = vmatprep.subr.bf16.mxu1 %v3760_v29  ;;  %v3817_v29 = vld [vmem:[%s5129_s1 + $0x194] ss:$8 sps:$4 sm:$0xff]   ;;  %1523 = vperm.xlu1 %3466, %v282_v15  }
  0xa4   : > { %1446 = vmatmul.mubr.bf16.gmra.mxu0 %v4498_v20  ;;  %1528 = vperm.xlu0 %3465, %v283_v19  }
  0xa5   : > { %2616 = vmatmul.mubr.bf16.gmra.mxu1 %v4202_v41  ;;  %2679 = vmatpush1.bf16.msra.mxu0 %v3755_v21  ;;  %v3775_v41 = vld [vmem:[%s5129_s1 + $0x2f4] ss:$8 sps:$4 sm:$0xff]   ;;  %v4649_v21 = vld [vmem:[%s4029_s21 + $0x160] ss:$24 sps:$4 sm:$0xff]  }
  0xa6   : > { %2792 = vmatpush1.bf16.msra.mxu1 %v3758_v22  ;;  %2680 = vmatprep.subr.bf16.mxu0 %v3763_v26  ;;  %v3815_v22 = vld [vmem:[%s5129_s1 + $0x190] ss:$8 sps:$4 sm:$0xff]  }
  0xa7   : > { %2793 = vmatprep.subr.bf16.mxu1 %v3766_v35  ;;  %1455 = vmatprep.mubr.bf16.mxu0 %v4513_v27  ;;  %v3818_v26 = vld [vmem:[%s5129_s1 + $0x290] ss:$8 sps:$4 sm:$0xff]   ;;  %v3826_v35 = vld [vmem:[%s5129_s1 + $0x284] ss:$8 sps:$4 sm:$0xff]  }
  0xa8   : > { %2625 = vmatprep.mubr.bf16.mxu1 %v4218_v47  ;;  %v3778_v47 = vld [vmem:[%s5129_s1 + $0x1e4] ss:$8 sps:$4 sm:$0xff]  }
  0xa9   : > { %2681 = vmatpush1.bf16.msra.mxu0 %v3761_v28  ;;  %v3829_v28 = vld [vmem:[%s4029_s21 + $0xc] ss:$24 sps:$4 sm:$0xff]  }
  0xaa   : > { %2794 = vmatpush1.bf16.msra.mxu1 %v3764_v30  ;;  %2682 = vmatprep.subr.bf16.mxu0 %v3772_v33  ;;  %v3821_v30 = vld [vmem:[%s5129_s1 + $0x180] ss:$8 sps:$4 sm:$0xff]  }
  0xab   : > { %2795 = vmatprep.subr.bf16.mxu1 %v3775_v41  ;;  %v3824_v33 = vld [vmem:[%s5129_s1 + $0x280] ss:$8 sps:$4 sm:$0xff]   ;;  %v284_v41 = vld [vmem:[%s4540_s15 + $0x38] sm:$0xff] }
  0xac   : > { %1456 = vmatmul.mubr.bf16.gmra.mxu0 %v4533_v34  ;;  %1533 = vperm.xlu1 %3466, %v284_v41  }
  0xad   : > { %2626 = vmatmul.mubr.bf16.gmra.mxu1 %v4239_v54  ;;  %2683 = vmatpush2.bf16.msra.mxu0 %v3770_v36  ;;  %v3790_v54 = vld [vmem:[%s5129_s1 + $0x2d4] ss:$8 sps:$4 sm:$0xff]   ;;  %v285_v36 = vld [vmem:[%s4540_s15 + $0x40] sm:$0xff] }
  0xae   : > { %2796 = vmatpush2.bf16.msra.mxu1 %v3773_v37  ;;  %2684 = vmatprep.subr.bf16.mxu0 %v3778_v47  ;;  %v3830_v37 = vld [vmem:[%s4029_s21 + $0x3c] ss:$24 sps:$4 sm:$0xff]   ;;  %v286_v47 = vld [vmem:[%s4540_s15 + $0x48] sm:$0xff] }
  0xaf   : > { %2797 = vmatprep.subr.bf16.mxu1 %v3781_v39  ;;  %1465 = vmatprep.mubr.bf16.mxu0 %v4556_v42  ;;  %v287_v39 = vld [vmem:[%s4540_s15 + $0x50] sm:$0xff] }
  0xb0   : > { %2635 = vmatprep.mubr.bf16.mxu1 %v4257_v60  ;;  %v3793_v60 = vld [vmem:[%s5129_s1 + $0x1c4] ss:$8 sps:$4 sm:$0xff]   ;;  %1538 = vperm.xlu0 %3465, %v285_v36  }
  0xb1   : > { %2685 = vmatpush2.bf16.msra.mxu0 %v3776_v43  ;;  %1543 = vperm.xlu1 %3466, %v286_v47   ;;  %v3832_v43 = vld [vmem:[%s4029_s21 + $0x38] ss:$24 sps:$4 sm:$0xff]  }
  0xb2   : > { %2798 = vmatpush2.bf16.msra.mxu1 %v3779_v45  ;;  %2686 = vmatprep.subr.bf16.mxu0 %v3787_v49  ;;  %v3833_v45 = vld [vmem:[%s4029_s21 + $0x6c] ss:$24 sps:$4 sm:$0xff]   ;;  %v3836_v49 = vld [vmem:[%s4029_s21 + $0x9c] ss:$24 sps:$4 sm:$0xff]  }
  0xb3   : > { %2799 = vmatprep.subr.bf16.mxu1 %v3790_v54  ;;  %v1674_v54 = vld [vmem:[%s4693_s19 + $0x8] sm:$0xff] }
  0xb4   : > { %1466 = vmatmul.mubr.bf16.gmra.mxu0 %v4577_v52  ;;  %1548 = vperm.xlu0 %3465, %v287_v39  }
  0xb5   : > { %2636 = vmatmul.mubr.bf16.gmra.mxu1 %v4279_v2  ;;  %2687 = vmatpush2.bf16.msra.mxu0 %v3785_v53  ;;  %v3805_v2 = vld [vmem:[%s5129_s1 + $0x2b4] ss:$8 sps:$4 sm:$0xff]  }
  0xb6   : > { %2800 = vmatpush2.bf16.msra.mxu1 %v3788_v56  ;;  %2688 = vmatprep.subr.bf16.mxu0 %v3793_v60  ;;  %v1675_v53 = vld [vmem:[%s4693_s19 + $0x10] sm:$0xff]  ;;  %v1677_v56 = vld [vmem:[%s4693_s19 + $0x20] sm:$0xff] }
  0xb7   : > { %2801 = vmatprep.subr.bf16.mxu1 %v3796_v4  ;;  %1475 = vmatprep.mubr.bf16.mxu0 %v4592_v58  ;;  %v3838_v60 = vld [vmem:[%s4029_s21 + $0x98] ss:$24 sps:$4 sm:$0xff]   ;;  %v1678_v4 = vld [vmem:[%s4693_s19 + $0x28] sm:$0xff] }
  0xb8   : > { %2645 = vmatprep.mubr.bf16.mxu1 %v4297_v9  ;;  %v3808_v9 = vld [vmem:[%s5129_s1 + $0x1a4] ss:$8 sps:$4 sm:$0xff]   ;;  %1558 = vperm.xlu0 %3465, %v289_v40  }
  0xb9   : > { %2689 = vmatpush2.bf16.msra.mxu0 %v3791_v59  ;;  %v1679_v59 = vld [vmem:[%s4693_s19 + $0x30] sm:$0xff] }
  0xba   : > { %2802 = vmatpush2.bf16.msra.mxu1 %v3794_v62  ;;  %2690 = vmatprep.subr.bf16.mxu0 %v3802_v1  ;;  %v1682_v62 = vld [vmem:[%s4693_s19 + $0x48] sm:$0xff] }
  0xbb   : > { %2803 = vmatprep.subr.bf16.mxu1 %v3805_v2 }
  0xbc   : > { %1476 = vmatmul.mubr.bf16.gmra.mxu0 %v4613_v5  ;;  %1568 = vperm.xlu0 %3465, %v291_v50  }
  0xbd   : > { %2646 = vmatmul.mubr.bf16.gmra.mxu1 %v4319_v17  ;;  %2691 = vmatpush2.bf16.msra.mxu0 %v3800_v16  ;;  %v3820_v17 = vld [vmem:[%s5129_s1 + $0x294] ss:$8 sps:$4 sm:$0xff]  }
  0xbe   : > { %2804 = vmatpush2.bf16.msra.mxu1 %v3803_v7  ;;  %2692 = vmatprep.subr.bf16.mxu0 %v3808_v9 }
  0xbf   : > { %2805 = vmatprep.subr.bf16.mxu1 %v3811_v8  ;;  %1485 = vmatprep.mubr.bf16.mxu0 %v4628_v12 }
  0xc0   : > { %2655 = vmatprep.mubr.bf16.mxu1 %v4337_v24  ;;  %v3823_v24 = vld [vmem:[%s5129_s1 + $0x184] ss:$8 sps:$4 sm:$0xff]  }
  0xc1   : > { %2693 = vmatpush2.bf16.msra.mxu0 %v3806_v23 }
  0xc2   : > { %2806 = vmatpush2.bf16.msra.mxu1 %v3809_v14  ;;  %2694 = vmatprep.subr.bf16.mxu0 %v3817_v29 }
  0xc3   : > { %2807 = vmatprep.subr.bf16.mxu1 %v3820_v17 }
  0xc4   : > { %1486 = vmatmul.mubr.bf16.gmra.mxu0 %v4649_v21 }
  0xc5   : > { %2656 = vmatmul.mubr.bf16.gmra.mxu1 %v4359_v31  ;;  %2695 = vmatpush2.bf16.msra.mxu0 %v3815_v22  ;;  %v3827_v31 = vld [vmem:[%s4029_s21 + $0x8] ss:$24 sps:$4 sm:$0xff]  }
  0xc6   : > { %2808 = vmatpush2.bf16.msra.mxu1 %v3818_v26  ;;  %2696 = vmatprep.subr.bf16.mxu0 %v3823_v24 }
  0xc7   : > { %2809 = vmatprep.subr.bf16.mxu1 %v3826_v35  ;;  %2698 = vmatprep.mubr.bf16.mxu0 %v3829_v28 }
  0xc8   : > { %2811 = vmatprep.mubr.bf16.mxu1 %v4377_v38  ;;  %v288_v38 = vld [vmem:[%s4540_s15 + $0x58] sm:$0xff] }
  0xc9   : > { %2697 = vmatpush2.bf16.msra.mxu0 %v3821_v30  ;;  %1553 = vperm.xlu1 %3466, %v288_v38  }
  0xca   : > { %2810 = vmatpush2.bf16.msra.mxu1 %v3824_v33 }
  0xcc   : > { %2699 = vmatmul.mubr.bf16.vlgmr.msra.gmra.mxu0 %v3827_v31 }
  0xcd   : > { %2812 = vmatmul.mubr.bf16.vlgmr.msra.gmra.mxu1 %v4394_v44  ;;  %2708 = vmatprep.mubr.bf16.mxu0 %v3830_v37  ;;  %v292_v44 = vld [vmem:[%s4540_s15 + $0x78] sm:$0xff] }
  0xce   : > { %2821 = vmatprep.mubr.bf16.mxu1 %v4411_v51  ;;  %1563 = vperm.xlu1 %3466, %v290_v46   ;;  %v1673_v51 = vld [vmem:[%s4693_s19] sm:$0xff] }
  0xcf   : > { %2894 = vperm.xlu0 %3465, %v1673_v51  }
  0xd2   : > { %1573 = vperm.xlu1 %3466, %v292_v44  }
  0xd3   : > { %2904 = vperm.xlu0 %3465, %v1675_v53  }
  0xd4   : > { %2709 = vmatmul.mubr.bf16.gmra.mxu0 %v3832_v43 }
  0xd5   : > { %2822 = vmatmul.mubr.bf16.gmra.mxu1 %v4430_v57  ;;  %2718 = vmatprep.mubr.bf16.mxu0 %v3833_v45  ;;  %v3835_v57 = vld [vmem:[%s4029_s21 + $0x68] ss:$24 sps:$4 sm:$0xff]   ;;  %s3454_s21 = sshll.u32 %s5141_s9, 4 }
  0xd6   : > { %2831 = vmatprep.mubr.bf16.mxu1 %v4445_v63  ;;  %2899 = vperm.xlu1 %3466, %v1674_v54   ;;  %v1676_v63 = vld [vmem:[%s4693_s19 + $0x18] sm:$0xff]  ;;  %s4844_s20 = scalar_lea.vmem %s5133_s5, %s3454_s21 }
  0xd7   : > { %2914 = vperm.xlu0 %3465, %v1677_v56  }
  0xda   : > { %2909 = vperm.xlu1 %3466, %v1676_v63  }
  0xdb   : > { %2924 = vperm.xlu0 %3465, %v1679_v59  }
  0xdc   : > { %2719 = vmatmul.mubr.bf16.gmra.mxu0 %v3835_v57 }
  0xdd   : > { %2832 = vmatmul.mubr.bf16.gmra.mxu1 %v4464_v6  ;;  %2728 = vmatprep.mubr.bf16.mxu0 %v3836_v49  ;;  %v1680_v6 = vld [vmem:[%s4693_s19 + $0x38] sm:$0xff] }
  0xde   : > { %2841 = vmatprep.mubr.bf16.mxu1 %v4479_v13  ;;  %2919 = vperm.xlu1 %3466, %v1678_v4   ;;  %v1681_v13 = vld [vmem:[%s4693_s19 + $0x40] sm:$0xff] }
  0xdf   : > { %2934 = vperm.xlu0 %3465, %v1681_v13  }
  0xe2   : > { %2929 = vperm.xlu1 %3466, %v1680_v6  }
  0xe3   : > { %2944 = vperm.xlu0 %3465, %v1683_v10  }
  0xe4   : > { %2729 = vmatmul.mubr.bf16.gmra.mxu0 %v3838_v60 }
  0xe5   : > { %2842 = vmatmul.mubr.bf16.gmra.mxu1 %v4498_v20  ;;  %2738 = vmatprep.mubr.bf16.mxu0 %v4221_v48  ;;  %v1684_v48 = vld [vmem:[%s4693_s19 + $0x58] sm:$0xff]  ;;  %v1685_v20 = vld [vmem:[%s4693_s19 + $0x60] sm:$0xff] }
  0xe6   : > { %2851 = vmatprep.mubr.bf16.mxu1 %v4513_v27  ;;  %2939 = vperm.xlu1 %3466, %v1682_v62   ;;  %v1686_v27 = vld [vmem:[%s4693_s19 + $0x68] sm:$0xff] }
  0xe7   : > { %2954 = vperm.xlu0 %3465, %v1685_v20  }
  0xea   : > { %2949 = vperm.xlu1 %3466, %v1684_v48  }
  0xeb   : > { %2964 = vperm.xlu0 %3465, %v1687_v0  }
  0xec   : > { %2739 = vmatmul.mubr.bf16.gmra.mxu0 %v4242_v55  ;;  %v1688_v55 = vld [vmem:[%s4693_s19 + $0x78] sm:$0xff] }
  0xed   : > { %2852 = vmatmul.mubr.bf16.gmra.mxu1 %v4533_v34  ;;  %2748 = vmatprep.mubr.bf16.mxu0 %v4260_v61 }
  0xee   : > { %2861 = vmatprep.mubr.bf16.mxu1 %v4556_v42  ;;  %2959 = vperm.xlu1 %3466, %v1686_v27  }
  0xf2   : > { %2969 = vperm.xlu1 %3466, %v1688_v55  }
  0xf4   : > { %2749 = vmatmul.mubr.bf16.gmra.mxu0 %v4282_v3 }
  0xf5   : > { %2862 = vmatmul.mubr.bf16.gmra.mxu1 %v4577_v52  ;;  %2758 = vmatprep.mubr.bf16.mxu0 %v4300_v11 }
  0xf6   : > { %2871 = vmatprep.mubr.bf16.mxu1 %v4592_v58 }
  0xfc   : > { %2759 = vmatmul.mubr.bf16.gmra.mxu0 %v4322_v18 }
  0xfd   : > { %2872 = vmatmul.mubr.bf16.gmra.mxu1 %v4613_v5  ;;  %2768 = vmatprep.mubr.bf16.mxu0 %v4340_v25 }
  0xfe   : > { %2881 = vmatprep.mubr.bf16.mxu1 %v4628_v12 }
 0x104   : > { %2769 = vmatmul.mubr.bf16.gmra.mxu0 %v4362_v32 }
 0x105   : > { %2882 = vmatmul.mubr.bf16.gmra.mxu1 %v4649_v21 }
 0x10c   : > { %v1191_v61 = vpop.f32.mrf.mxu0 }
 0x10d   : > { %v1304_v3 = vpop.f32.mrf.mxu1 }
 0x10e   : > { %v4735_v11 = vadd.f32 %v1304_v3, %v1191_v61  ;;  %v4737_v34 = vpop.f32.mrf.mxu0 }
 0x10f   : > { %v4739_v42 = vpop.f32.mrf.mxu1 }
 0x110   : > { %v1195_v52 = vpop.f32.mrf.mxu0 }
 0x111   : > { %v1308_v18 = vpop.f32.mrf.mxu1 }
 0x112   : > { %v4741_v58 = vadd.f32 %v1308_v18, %v1195_v52  ;;  %v4743_v1 = vpop.f32.mrf.mxu0 }
 0x113   : > { %v4745_v25 = vpop.f32.mrf.mxu1 }
 0x114   : > { %v1201_v2 = vpop.f32.mrf.mxu0 }
 0x115   : > { %v1314_v32 = vpop.f32.mrf.mxu1 }
 0x116   : > { %v4747_v5 = vadd.f32 %v1314_v32, %v1201_v2  ;;  %v4749_v16 = vpop.f32.mrf.mxu0 }
 0x117   : > { %v4751_v7 = vpop.f32.mrf.mxu1 }
 0x118   : > { %v1205_v9 = vpop.f32.mrf.mxu0 }
 0x119   : > { %v1318_v8 = vpop.f32.mrf.mxu1 }
 0x11a   : > { %v4753_v12 = vadd.f32 %v1318_v8, %v1205_v9  ;;  %v4755_v23 = vpop.f32.mrf.mxu0 }
 0x11b   : > { %v4757_v14 = vpop.f32.mrf.mxu1 }
 0x11c   : > { %v1211_v15 = vpop.f32.mrf.mxu0 }
 0x11d   : > { %v1324_v19 = vpop.f32.mrf.mxu1 }
 0x11e   : > { %v4759_v29 = vadd.f32 %v1324_v19, %v1211_v15  ;;  %v4761_v17 = vpop.f32.mrf.mxu0 }
 0x11f   : > { %v4763_v21 = vpop.f32.mrf.mxu1 }
 0x120   : > { %v1215_v22 = vpop.f32.mrf.mxu0 }
 0x121   : > { %v1328_v26 = vpop.f32.mrf.mxu1 }
 0x122   : > { %v4765_v24 = vadd.f32 %v1328_v26, %v1215_v22  ;;  %v4767_v35 = vpop.f32.mrf.mxu0 }
 0x123   : > { %v4769_v28 = vpop.f32.mrf.mxu1 }
 0x124   : > { %v1221_v30 = vpop.f32.mrf.mxu0 }
 0x125   : > { %v1334_v33 = vpop.f32.mrf.mxu1 }
 0x126   : > { %v4771_v41 = vadd.f32 %v1334_v33, %v1221_v30  ;;  %v4773_v36 = vpop.f32.mrf.mxu0 }
 0x127   : > { %v4775_v31 = vpop.f32.mrf.mxu1 }
 0x128   : > { %v1225_v37 = vpop.f32.mrf.mxu0 }
 0x129   : > { %v1338_v47 = vpop.f32.mrf.mxu1 }
 0x12a   : > { %v4777_v39 = vadd.f32 %v1338_v47, %v1225_v37  ;;  %v4779_v38 = vpop.f32.mrf.mxu0  ;;  %v1499_v37 = vpop.permute.xlu0 %1498 }
 0x12b   : > { %v4781_v40 = vpop.f32.mrf.mxu1 }
 0x12c   : > { %v1231_v43 = vpop.f32.mrf.mxu0 }
 0x12d   : > { %v1344_v45 = vpop.f32.mrf.mxu1 }
 0x12e   : > { %v4783_v46 = vadd.f32 %v1344_v45, %v1231_v43  ;;  %v4785_v50 = vpop.f32.mrf.mxu0 }
 0x12f   : > { %v4787_v44 = vpop.f32.mrf.mxu1 }
 0x130   : > { %v1235_v51 = vpop.f32.mrf.mxu0 }
 0x131   : > { %v1348_v57 = vpop.f32.mrf.mxu1 }
 0x132   : > { %v4789_v49 = vadd.f32 %v1348_v57, %v1235_v51  ;;  %v4791_v54 = vpop.f32.mrf.mxu0  ;;  %v1307_v57 = vadd.f32 %v4739_v42, %v4737_v34 }
 0x133   : > { %v4793_v53 = vpop.f32.mrf.mxu1 }
 0x134   : > { %v1241_v63 = vpop.f32.mrf.mxu0 }
 0x135   : > { %v1354_v56 = vpop.f32.mrf.mxu1 }
 0x136   : > { %v4795_v60 = vadd.f32 %v1354_v56, %v1241_v63  ;;  %v4797_v4 = vpop.f32.mrf.mxu0 }
 0x137   : > { %v4799_v59 = vpop.f32.mrf.mxu1 }
 0x138   : > { %v1245_v6 = vpop.f32.mrf.mxu0 }
 0x139   : > { %v1358_v13 = vpop.f32.mrf.mxu1 }
 0x13a   : > { %v4801_v62 = vadd.f32 %v1358_v13, %v1245_v6  ;;  %v4803_v10 = vpop.f32.mrf.mxu0 }
 0x13b   : > { %v4805_v48 = vpop.f32.mrf.mxu1 }
 0x13c   : > { %v1251_v20 = vpop.f32.mrf.mxu0 }
 0x13d   : > { %v1364_v27 = vpop.f32.mrf.mxu1 }
 0x13e   : > { %v4807_v0 = vadd.f32 %v1364_v27, %v1251_v20  ;;  %v4809_v55 = vpop.f32.mrf.mxu0  ;;  %v1504_v27 = vpop.permute.xlu0 %1503 }
 0x13f   : > { %v4811_v61 = vpop.f32.mrf.mxu1 }
 0x140   : > { %v1255_v3 = vpop.f32.mrf.mxu0 }
 0x141   : > { %v1368_v52 = vpop.f32.mrf.mxu1 }
 0x142   : > { %v4813_v18 = vadd.f32 %v1368_v52, %v1255_v3  ;;  %v4815_v2 = vpop.f32.mrf.mxu0 }
 0x143   : > { %v4817_v32 = vpop.f32.mrf.mxu1 }
 0x144   : > { %v1261_v9 = vpop.f32.mrf.mxu0 }
 0x145   : > { %v1374_v8 = vpop.f32.mrf.mxu1 }
 0x146   : > { %v4819_v15 = vadd.f32 %v1374_v8, %v1261_v9  ;;  %v4821_v19 = vpop.f32.mrf.mxu0  ;;  %v1509_v9 = vpop.permute.xlu1 %1508 }
 0x147   : > { %v4823_v22 = vpop.f32.mrf.mxu1 }
 0x148   : > { %v1265_v26 = vpop.f32.mrf.mxu0 }
 0x149   : > { %v1378_v30 = vpop.f32.mrf.mxu1 }
 0x14a   : > { %v4825_v33 = vadd.f32 %v1378_v30, %v1265_v26  ;;  %v4827_v47 = vpop.f32.mrf.mxu0 }
 0x14b   : > { %v4829_v43 = vpop.f32.mrf.mxu1 }
 0x14c   : > { %v1417_v45 = vpop.f32.mrf.mxu0 }
 0x14d   : > { %v4831_v51 = vpop.f32.mrf.mxu1  ;;  %v1418_v63 = vadd.f32 %v1417_v45, %v4735_v11  ;;  %v1311_v11 = vadd.f32 %v4745_v25, %v4743_v1 }
 0x14e   : > { %v1419_v56 = vpop.f32.mrf.mxu0 }
 0x14f   : > { %v4837_v6 = vpop.f32.mrf.mxu1  ;;  %v4839_v13 = vmul.f32 %v1499_v37, %v1418_v63  ;;  %v1420_v20 = vadd.f32 %v1419_v56, %v1307_v57  ;;  %v1317_v56 = vadd.f32 %v4751_v7, %v4749_v16 }
 0x150   : > { %v1421_v3 = vpop.f32.mrf.mxu0 }
 0x151   : > { %v4846_v52 = vpop.f32.mrf.mxu1  ;;  %v1577_v34 = vmul.f32 %v1499_v37, %v1420_v20  ;;  %v1422_v42 = vadd.f32 %v1421_v3, %v4741_v58 }
 0x152   : > { %v1423_v8 = vpop.f32.mrf.mxu0 }
 0x153   : > { %v4851_v26 = vpop.f32.mrf.mxu1  ;;  %1610 = vst.msk [vmem:[%s4844_s20 + $0x8] sm:$0xff] %vm1609_vm0, %v1577_v34  ;;  %v4855_v30 = vmul.f32 %v1504_v27, %v1422_v42  ;;  %v1424_v45 = vadd.f32 %v1423_v8, %v1311_v11  ;;  %v1514_v34 = vpop.permute.xlu1 %1513  ;;  %v1321_v8 = vadd.f32 %v4757_v14, %v4755_v23 }
 0x154   : > { %v1427_v57 = vpop.f32.mrf.mxu0 }
 0x155   : > { %v4857_v63 = vpop.f32.mrf.mxu1  ;;  %v1579_v1 = vmul.f32 %v1504_v27, %v1424_v45  ;;  %v1428_v25 = vadd.f32 %v1427_v57, %v4747_v5 }
 0x156   : > { %v1429_v58 = vpop.f32.mrf.mxu0 }
 0x157   : > { %v4862_v37 = vpop.f32.mrf.mxu1  ;;  %1612 = vst.msk [vmem:[%s4844_s20 + $0x18] sm:$0xff] %vm1609_vm0, %v1579_v1  ;;  %v4866_v20 = vmul.f32 %v1509_v9, %v1428_v25  ;;  %v1430_v3 = vadd.f32 %v1429_v58, %v1317_v56  ;;  %v1519_v56 = vpop.permute.xlu0 %1518  ;;  %v1327_v58 = vadd.f32 %v4763_v21, %v4761_v17 }
 0x158   : > { %v1431_v11 = vpop.f32.mrf.mxu0  ;;  %v1524_v17 = vpop.permute.xlu1 %1523 }
 0x159   : > { %v4868_v42 = vpop.f32.mrf.mxu1  ;;  %v1581_v16 = vmul.f32 %v1509_v9, %v1430_v3  ;;  %v1432_v7 = vadd.f32 %v1431_v11, %v4753_v12 }
 0x15a   : > { %v1433_v5 = vpop.f32.mrf.mxu0 }
 0x15b   : > { %v4873_v27 = vpop.f32.mrf.mxu1  ;;  %1614 = vst.msk [vmem:[%s4844_s20 + $0x28] sm:$0xff] %vm1609_vm0, %v1581_v16  ;;  %v4877_v45 = vmul.f32 %v1514_v34, %v1432_v7  ;;  %v1434_v57 = vadd.f32 %v1433_v5, %v1321_v8  ;;  %v1331_v7 = vadd.f32 %v4769_v28, %v4767_v35  ;;  %v1529_v28 = vpop.permute.xlu0 %1528 }
 0x15c   : > { %v1437_v1 = vpop.f32.mrf.mxu0 }
 0x15d   : > { %v4879_v25 = vpop.f32.mrf.mxu1  ;;  %v1583_v23 = vmul.f32 %v1514_v34, %v1434_v57  ;;  %v1438_v14 = vadd.f32 %v1437_v1, %v4759_v29 }
 0x15e   : > { %v1439_v12 = vpop.f32.mrf.mxu0 }
 0x15f   : > { %v4884_v9 = vpop.f32.mrf.mxu1  ;;  %1616 = vst.msk [vmem:[%s4844_s20 + $0x38] sm:$0xff] %vm1609_vm0, %v1583_v23  ;;  %v4888_v3 = vmul.f32 %v1519_v56, %v1438_v14  ;;  %v1440_v11 = vadd.f32 %v1439_v12, %v1327_v58  ;;  %v1337_v14 = vadd.f32 %v4775_v31, %v4773_v36  ;;  %v1534_v36 = vpop.permute.xlu1 %1533 }
 0x160   : > { %v1441_v8 = vpop.f32.mrf.mxu0 }
 0x161   : > { %v4890_v16 = vpop.f32.mrf.mxu1  ;;  %v1585_v5 = vmul.f32 %v1519_v56, %v1440_v11  ;;  %v1442_v21 = vadd.f32 %v1441_v8, %v4765_v24 }
 0x162   : > { %v1443_v29 = vpop.f32.mrf.mxu0 }
 0x163   : > { %v4895_v34 = vpop.f32.mrf.mxu1  ;;  %1618 = vst.msk [vmem:[%s4844_s20 + $0x48] sm:$0xff] %vm1609_vm0, %v1585_v5  ;;  %v4899_v57 = vmul.f32 %v1524_v17, %v1442_v21  ;;  %v1444_v1 = vadd.f32 %v1443_v29, %v1331_v7  ;;  %v1341_v21 = vadd.f32 %v4781_v40, %v4779_v38  ;;  %v1539_v38 = vpop.permute.xlu0 %1538 }
 0x164   : > { %v1447_v58 = vpop.f32.mrf.mxu0 }
 0x165   : > { %v4901_v23 = vpop.f32.mrf.mxu1  ;;  %v1587_v35 = vmul.f32 %v1524_v17, %v1444_v1  ;;  %v1448_v56 = vadd.f32 %v1447_v58, %v4771_v41 }
 0x166   : > { %v1449_v24 = vpop.f32.mrf.mxu0 }
 0x167   : > { %v4906_v12 = vpop.f32.mrf.mxu1  ;;  %1620 = vst.msk [vmem:[%s4844_s20 + $0x58] sm:$0xff] %vm1609_vm0, %v1587_v35  ;;  %v4910_v11 = vmul.f32 %v1529_v28, %v1448_v56  ;;  %v1450_v8 = vadd.f32 %v1449_v24, %v1337_v14  ;;  %v1347_v56 = vadd.f32 %v4787_v44, %v4785_v50  ;;  %v1544_v50 = vpop.permute.xlu1 %1543 }
 0x168   : > { %v1451_v7 = vpop.f32.mrf.mxu0 }
 0x169   : > { %v4912_v5 = vpop.f32.mrf.mxu1  ;;  %v1589_v31 = vmul.f32 %v1529_v28, %v1450_v8  ;;  %v1452_v17 = vadd.f32 %v1451_v7, %v4777_v39 }
 0x16a   : > { %v1453_v41 = vpop.f32.mrf.mxu0 }
 0x16b   : > { %v4917_v29 = vpop.f32.mrf.mxu1  ;;  %1622 = vst.msk [vmem:[%s4844_s20 + $0x68] sm:$0xff] %vm1609_vm0, %v1589_v31  ;;  %v4921_v1 = vmul.f32 %v1534_v36, %v1452_v17  ;;  %v1454_v58 = vadd.f32 %v1453_v41, %v1341_v21  ;;  %v1351_v17 = vadd.f32 %v4793_v53, %v4791_v54  ;;  %v1549_v54 = vpop.permute.xlu0 %1548 }
 0x16c   : > { %v1457_v14 = vpop.f32.mrf.mxu0 }
 0x16d   : > { %v4923_v35 = vpop.f32.mrf.mxu1  ;;  %v1591_v40 = vmul.f32 %v1534_v36, %v1454_v58  ;;  %v1458_v28 = vadd.f32 %v1457_v14, %v4783_v46 }
 0x16e   : > { %v1459_v39 = vpop.f32.mrf.mxu0 }
 0x16f   : > { %v4928_v24 = vpop.f32.mrf.mxu1  ;;  %1624 = vst.msk [vmem:[%s4844_s20 + $0x78] sm:$0xff] %vm1609_vm0, %v1591_v40  ;;  %v4932_v8 = vmul.f32 %v1539_v38, %v1458_v28  ;;  %v1460_v7 = vadd.f32 %v1459_v39, %v1347_v56  ;;  %v1357_v28 = vadd.f32 %v4799_v59, %v4797_v4  ;;  %v1554_v4 = vpop.permute.xlu1 %1553 }
 0x170   : > { %v1461_v21 = vpop.f32.mrf.mxu0 }
 0x171   : > { %v4934_v31 = vpop.f32.mrf.mxu1  ;;  %v1593_v44 = vmul.f32 %v1539_v38, %v1460_v7  ;;  %v1462_v36 = vadd.f32 %v1461_v21, %v4789_v49 }
 0x172   : > { %v1463_v46 = vpop.f32.mrf.mxu0 }
 0x173   : > { %v4939_v41 = vpop.f32.mrf.mxu1  ;;  %1626 = vst.msk [vmem:[%s4844_s20 + $0x88] sm:$0xff] %vm1609_vm0, %v1593_v44  ;;  %v4943_v58 = vmul.f32 %v1544_v50, %v1462_v36  ;;  %v1464_v14 = vadd.f32 %v1463_v46, %v1351_v17  ;;  %v1361_v36 = vadd.f32 %v4805_v48, %v4803_v10  ;;  %v1559_v10 = vpop.permute.xlu0 %1558 }
 0x174   : > { %v1467_v56 = vpop.f32.mrf.mxu0 }
 0x175   : > { %v4945_v40 = vpop.f32.mrf.mxu1  ;;  %v1595_v53 = vmul.f32 %v1544_v50, %v1464_v14  ;;  %v1468_v38 = vadd.f32 %v1467_v56, %v4795_v60 }
 0x176   : > { %v1469_v49 = vpop.f32.mrf.mxu0 }
 0x177   : > { %v4950_v39 = vpop.f32.mrf.mxu1  ;;  %1628 = vst.msk [vmem:[%s4844_s20 + $0x98] sm:$0xff] %vm1609_vm0, %v1595_v53  ;;  %v4954_v7 = vmul.f32 %v1549_v54, %v1468_v38  ;;  %v1470_v21 = vadd.f32 %v1469_v49, %v1357_v28  ;;  %v1367_v38 = vadd.f32 %v4811_v61, %v4809_v55  ;;  %v1564_v55 = vpop.permute.xlu1 %1563 }
 0x178   : > { %v1471_v17 = vpop.f32.mrf.mxu0 }
 0x179   : > { %v4956_v44 = vpop.f32.mrf.mxu1  ;;  %v1597_v59 = vmul.f32 %v1549_v54, %v1470_v21  ;;  %v1472_v50 = vadd.f32 %v1471_v17, %v4801_v62 }
 0x17a   : > { %v1473_v60 = vpop.f32.mrf.mxu0 }
 0x17b   : > { %v4961_v46 = vpop.f32.mrf.mxu1  ;;  %1630 = vst.msk [vmem:[%s4844_s20 + $0xa8] sm:$0xff] %vm1609_vm0, %v1597_v59  ;;  %v4965_v14 = vmul.f32 %v1554_v4, %v1472_v50  ;;  %v1474_v56 = vadd.f32 %v1473_v60, %v1361_v36  ;;  %v1371_v50 = vadd.f32 %v4817_v32, %v4815_v2  ;;  %v1569_v2 = vpop.permute.xlu0 %1568 }
 0x17c   : > { %v1477_v28 = vpop.f32.mrf.mxu0 }
 0x17d   : > { %v4967_v53 = vpop.f32.mrf.mxu1  ;;  %v1599_v48 = vmul.f32 %v1554_v4, %v1474_v56  ;;  %v1478_v54 = vadd.f32 %v1477_v28, %v4807_v0 }
 0x17e   : > { %v1479_v62 = vpop.f32.mrf.mxu0 }
 0x17f   : > { %v4972_v49 = vpop.f32.mrf.mxu1  ;;  %1632 = vst.msk [vmem:[%s4844_s20 + $0xb8] sm:$0xff] %vm1609_vm0, %v1599_v48  ;;  %v4976_v21 = vmul.f32 %v1559_v10, %v1478_v54  ;;  %v1480_v17 = vadd.f32 %v1479_v62, %v1367_v38  ;;  %v1377_v54 = vadd.f32 %v4823_v22, %v4821_v19  ;;  %v1574_v19 = vpop.permute.xlu1 %1573 }
 0x180   : > { %v1481_v36 = vpop.f32.mrf.mxu0 }
 0x181   : > { %v4978_v59 = vpop.f32.mrf.mxu1  ;;  %v1601_v61 = vmul.f32 %v1559_v10, %v1480_v17  ;;  %v1482_v4 = vadd.f32 %v1481_v36, %v4813_v18 }
 0x182   : > { %v1483_v0 = vpop.f32.mrf.mxu0 }
 0x183   : > { %v4983_v60 = vpop.f32.mrf.mxu1  ;;  %1634 = vst.msk [vmem:[%s4844_s20 + $0xc8] sm:$0xff] %vm1609_vm0, %v1601_v61  ;;  %v4987_v56 = vmul.f32 %v1564_v55, %v1482_v4  ;;  %v1484_v28 = vadd.f32 %v1483_v0, %v1371_v50  ;;  %v1381_v4 = vadd.f32 %v4829_v43, %v4827_v47  ;;  %v2895_v43 = vpop.permute.xlu0 %2894 }
 0x184   : > { %v1487_v38 = vpop.f32.mrf.mxu0 }
 0x185   : > { %v4989_v48 = vpop.f32.mrf.mxu1  ;;  %v1603_v32 = vmul.f32 %v1564_v55, %v1484_v28  ;;  %v1488_v10 = vadd.f32 %v1487_v38, %v4819_v15 }
 0x186   : > { %v1489_v18 = vpop.f32.mrf.mxu0 }
 0x187   : > { %v4994_v62 = vpop.f32.mrf.mxu1  ;;  %1636 = vst.msk [vmem:[%s4844_s20 + $0xd8] sm:$0xff] %vm1609_vm0, %v1603_v32  ;;  %v4998_v17 = vmul.f32 %v1569_v2, %v1488_v10  ;;  %v1490_v36 = vadd.f32 %v1489_v18, %v1377_v54 }
 0x188   : > { %v1491_v50 = vpop.f32.mrf.mxu0 }
 0x189   : > { %5134 = vst [vmem:[#allocation2_spill] sm:$0xff] %v4998_v17  ;;  %v5000_v61 = vpop.f32.mrf.mxu1  ;;  %v1605_v22 = vmul.f32 %v1569_v2, %v1490_v36  ;;  %v1492_v55 = vadd.f32 %v1491_v50, %v4825_v33 }
 0x18a   : > { %v1493_v15 = vpop.f32.mrf.mxu0 }
 0x18b   : > { %v5005_v0 = vpop.f32.mrf.mxu1  ;;  %1638 = vst.msk [vmem:[%s4844_s20 + $0xe8] sm:$0xff] %vm1609_vm0, %v1605_v22  ;;  %v5009_v28 = vmul.f32 %v1574_v19, %v1492_v55  ;;  %v1494_v38 = vadd.f32 %v1493_v15, %v1381_v4 }
 0x18c   : > { %5135 = vst [vmem:[#allocation3_spill] sm:$0xff] %v5005_v0  ;;  %v2700_v54 = vpop.f32.mrf.mxu0  ;;  %v2905_v0 = vpop.permute.xlu0 %2904 }
 0x18d   : > { %5136 = vst [vmem:[#allocation4_spill] sm:$0xff] %v5009_v28  ;;  %v2813_v32 = vpop.f32.mrf.mxu1  ;;  %v1607_v10 = vmul.f32 %v1574_v19, %v1494_v38  ;;  %v2701_v18 = vadd.f32 %v2700_v54, %v4831_v51  ;;  %v2900_v38 = vpop.permute.xlu1 %2899 }
 0x18e   : > { %v2702_v17 = vpop.f32.mrf.mxu0 }
 0x18f   : > { %v2815_v47 = vpop.f32.mrf.mxu1  ;;  %1640 = vst.msk [vmem:[%s4844_s20 + $0xf8] sm:$0xff] %vm1609_vm0, %v1607_v10  ;;  %v2814_v33 = vadd.f32 %v2813_v32, %v2701_v18  ;;  %v2703_v2 = vadd.f32 %v2702_v17, %v4837_v6  ;;  %v1642_v32 = vld [vmem:[%s4844_s20 + $0x8] sm:$0xff] }
 0x190   : > { %v2704_v36 = vpop.f32.mrf.mxu0 }
 0x191   : > { %v2817_v50 = vpop.f32.mrf.mxu1  ;;  %v2972_v22 = vmul.f32 %v2895_v43, %v2814_v33  ;;  %v2816_v55 = vadd.f32 %v2815_v47, %v2703_v2  ;;  %v2705_v4 = vadd.f32 %v2704_v36, %v4846_v52 }
 0x192   : > { %v2706_v15 = vpop.f32.mrf.mxu0 }
 0x193   : > { %v2819_v19 = vpop.f32.mrf.mxu1  ;;  %v3004_v51 = vadd.f32 %v2972_v22, %v4839_v13  ;;  %v2973_v54 = vmul.f32 %v2895_v43, %v2816_v55  ;;  %v2818_v28 = vadd.f32 %v2817_v50, %v2705_v4  ;;  %v2707_v10 = vadd.f32 %v2706_v15, %v4851_v26  ;;  %v1644_v22 = vld [vmem:[%s4844_s20 + $0x18] sm:$0xff] }
 0x194   : > { %v2710_v6 = vpop.f32.mrf.mxu0 }
 0x195   : > { %v2823_v17 = vpop.f32.mrf.mxu1  ;;  %3036 = vst [vmem:[%s4844_s20] sm:$0xff] %v3004_v51  ;;  %v3005_v18 = vadd.f32 %v2973_v54, %v1642_v32  ;;  %v2974_v47 = vmul.f32 %v2900_v38, %v2818_v28  ;;  %v2820_v33 = vadd.f32 %v2819_v19, %v2707_v10  ;;  %v2711_v52 = vadd.f32 %v2710_v6, %v4857_v63  ;;  %v2910_v10 = vpop.permute.xlu1 %2909  ;;  %v1646_v6 = vld [vmem:[%s4844_s20 + $0x28] sm:$0xff] }
 0x196   : > { %v2712_v2 = vpop.f32.mrf.mxu0 }
 0x197   : > { %v2825_v36 = vpop.f32.mrf.mxu1  ;;  %3037 = vst.msk [vmem:[%s4844_s20 + $0x8] sm:$0xff] %vm1609_vm0, %v3005_v18  ;;  %v3006_v13 = vadd.f32 %v2974_v47, %v4855_v30  ;;  %v2975_v26 = vmul.f32 %v2900_v38, %v2820_v33  ;;  %v2824_v43 = vadd.f32 %v2823_v17, %v2711_v52  ;;  %v2713_v50 = vadd.f32 %v2712_v2, %v4862_v37 }
 0x198   : > { %v2714_v55 = vpop.f32.mrf.mxu0 }
 0x199   : > { %v2827_v4 = vpop.f32.mrf.mxu1  ;;  %3038 = vst [vmem:[%s4844_s20 + $0x10] sm:$0xff] %v3006_v13  ;;  %v3007_v28 = vadd.f32 %v2975_v26, %v1644_v22  ;;  %v2976_v63 = vmul.f32 %v2905_v0, %v2824_v43  ;;  %v2826_v15 = vadd.f32 %v2825_v36, %v2713_v50  ;;  %v2715_v19 = vadd.f32 %v2714_v55, %v4868_v42  ;;  %v2915_v13 = vpop.permute.xlu0 %2914  ;;  %v1648_v43 = vld [vmem:[%s4844_s20 + $0x38] sm:$0xff] }
 0x19a   : > { %v2716_v51 = vpop.f32.mrf.mxu0 }
 0x19b   : > { %v2829_v54 = vpop.f32.mrf.mxu1  ;;  %3039 = vst.msk [vmem:[%s4844_s20 + $0x18] sm:$0xff] %vm1609_vm0, %v3007_v28  ;;  %v3008_v30 = vadd.f32 %v2976_v63, %v4866_v20  ;;  %v2977_v37 = vmul.f32 %v2905_v0, %v2826_v15  ;;  %v2828_v38 = vadd.f32 %v2827_v4, %v2715_v19  ;;  %v2717_v32 = vadd.f32 %v2716_v51, %v4873_v27  ;;  %v2920_v19 = vpop.permute.xlu1 %2919 }
 0x19c   : > { %v2720_v17 = vpop.f32.mrf.mxu0 }
 0x19d   : > { %v2833_v18 = vpop.f32.mrf.mxu1  ;;  %3040 = vst [vmem:[%s4844_s20 + $0x20] sm:$0xff] %v3008_v30  ;;  %v3009_v47 = vadd.f32 %v2977_v37, %v1646_v6  ;;  %v2978_v42 = vmul.f32 %v2910_v10, %v2828_v38  ;;  %v2830_v33 = vadd.f32 %v2829_v54, %v2717_v32  ;;  %v2721_v52 = vadd.f32 %v2720_v17, %v4879_v25 }
 0x19e   : > { %v2722_v2 = vpop.f32.mrf.mxu0 }
 0x19f   : > { %v2835_v36 = vpop.f32.mrf.mxu1  ;;  %3041 = vst.msk [vmem:[%s4844_s20 + $0x28] sm:$0xff] %vm1609_vm0, %v3009_v47  ;;  %v3010_v20 = vadd.f32 %v2978_v42, %v4877_v45  ;;  %v2979_v27 = vmul.f32 %v2910_v10, %v2830_v33  ;;  %v2834_v0 = vadd.f32 %v2833_v18, %v2721_v52  ;;  %v2723_v26 = vadd.f32 %v2722_v2, %v4884_v9  ;;  %v1650_v10 = vld [vmem:[%s4844_s20 + $0x48] sm:$0xff]  ;;  %v2925_v47 = vpop.permute.xlu0 %2924  ;;  %v1652_v52 = vld [vmem:[%s4844_s20 + $0x58] sm:$0xff] }
 0x1a0   : > { %v2724_v50 = vpop.f32.mrf.mxu0 }
 0x1a1   : > { %v2837_v22 = vpop.f32.mrf.mxu1  ;;  %3042 = vst [vmem:[%s4844_s20 + $0x30] sm:$0xff] %v3010_v20  ;;  %v3011_v55 = vadd.f32 %v2979_v27, %v1648_v43  ;;  %v2980_v25 = vmul.f32 %v2915_v13, %v2834_v0  ;;  %v2836_v4 = vadd.f32 %v2835_v36, %v2723_v26  ;;  %v2725_v28 = vadd.f32 %v2724_v50, %v4890_v16  ;;  %v2930_v43 = vpop.permute.xlu1 %2929 }
 0x1a2   : > { %v2726_v63 = vpop.f32.mrf.mxu0 }
 0x1a3   : > { %v2839_v15 = vpop.f32.mrf.mxu1  ;;  %3043 = vst.msk [vmem:[%s4844_s20 + $0x38] sm:$0xff] %vm1609_vm0, %v3011_v55  ;;  %v3012_v45 = vadd.f32 %v2980_v25, %v4888_v3  ;;  %v2981_v9 = vmul.f32 %v2915_v13, %v2836_v4  ;;  %v2838_v51 = vadd.f32 %v2837_v22, %v2725_v28  ;;  %v2727_v54 = vadd.f32 %v2726_v63, %v4895_v34  ;;  %v1654_v55 = vld [vmem:[%s4844_s20 + $0x68] sm:$0xff] }
 0x1a4   : > { %v2730_v30 = vpop.f32.mrf.mxu0 }
 0x1a5   : > { %v2843_v37 = vpop.f32.mrf.mxu1  ;;  %3044 = vst [vmem:[%s4844_s20 + $0x40] sm:$0xff] %v3012_v45  ;;  %v3013_v38 = vadd.f32 %v2981_v9, %v1650_v10  ;;  %v2982_v16 = vmul.f32 %v2920_v19, %v2838_v51  ;;  %v2840_v32 = vadd.f32 %v2839_v15, %v2727_v54  ;;  %v2731_v6 = vadd.f32 %v2730_v30, %v4901_v23  ;;  %v2935_v9 = vpop.permute.xlu0 %2934  ;;  %v1656_v10 = vld [vmem:[%s4844_s20 + $0x78] sm:$0xff] }
 0x1a6   : > { %v2732_v17 = vpop.f32.mrf.mxu0 }
 0x1a7   : > { %v2845_v18 = vpop.f32.mrf.mxu1  ;;  %3045 = vst.msk [vmem:[%s4844_s20 + $0x48] sm:$0xff] %vm1609_vm0, %v3013_v38  ;;  %v3014_v3 = vadd.f32 %v2982_v16, %v4899_v57  ;;  %v2983_v34 = vmul.f32 %v2920_v19, %v2840_v32  ;;  %v2844_v42 = vadd.f32 %v2843_v37, %v2731_v6  ;;  %v2733_v33 = vadd.f32 %v2732_v17, %v4906_v12 }
 0x1a8   : > { %v2734_v2 = vpop.f32.mrf.mxu0 }
 0x1a9   : > { %v2847_v36 = vpop.f32.mrf.mxu1  ;;  %3046 = vst [vmem:[%s4844_s20 + $0x50] sm:$0xff] %v3014_v3  ;;  %v3015_v13 = vadd.f32 %v2983_v34, %v1652_v52  ;;  %v2984_v23 = vmul.f32 %v2925_v47, %v2844_v42  ;;  %v2846_v20 = vadd.f32 %v2845_v18, %v2733_v33  ;;  %v2735_v27 = vadd.f32 %v2734_v2, %v4912_v5  ;;  %v2940_v18 = vpop.permute.xlu1 %2939  ;;  %v1658_v34 = vld [vmem:[%s4844_s20 + $0x88] sm:$0xff] }
 0x1aa   : > { %v2736_v0 = vpop.f32.mrf.mxu0 }
 0x1ab   : > { %v2849_v26 = vpop.f32.mrf.mxu1  ;;  %3047 = vst.msk [vmem:[%s4844_s20 + $0x58] sm:$0xff] %vm1609_vm0, %v3015_v13  ;;  %v3016_v57 = vadd.f32 %v2984_v23, %v4910_v11  ;;  %v2985_v12 = vmul.f32 %v2925_v47, %v2846_v20  ;;  %v2848_v50 = vadd.f32 %v2847_v36, %v2735_v27  ;;  %v2737_v22 = vadd.f32 %v2736_v0, %v4917_v29  ;;  %v2945_v20 = vpop.permute.xlu0 %2944 }
 0x1ac   : > { %v2740_v25 = vpop.f32.mrf.mxu0 }
 0x1ad   : > { %v2853_v4 = vpop.f32.mrf.mxu1  ;;  %3048 = vst [vmem:[%s4844_s20 + $0x60] sm:$0xff] %v3016_v57  ;;  %v3017_v28 = vadd.f32 %v2985_v12, %v1654_v55  ;;  %v2986_v5 = vmul.f32 %v2930_v43, %v2848_v50  ;;  %v2850_v63 = vadd.f32 %v2849_v26, %v2737_v22  ;;  %v2741_v15 = vadd.f32 %v2740_v25, %v4923_v35  ;;  %v1660_v26 = vld [vmem:[%s4844_s20 + $0x98] sm:$0xff] }
 0x1ae   : > { %v2742_v19 = vpop.f32.mrf.mxu0 }
 0x1af   : > { %v2855_v45 = vpop.f32.mrf.mxu1  ;;  %3049 = vst.msk [vmem:[%s4844_s20 + $0x68] sm:$0xff] %vm1609_vm0, %v3017_v28  ;;  %v3018_v11 = vadd.f32 %v2986_v5, %v4921_v1  ;;  %v2987_v29 = vmul.f32 %v2930_v43, %v2850_v63  ;;  %v2854_v51 = vadd.f32 %v2853_v4, %v2741_v15  ;;  %v2743_v54 = vadd.f32 %v2742_v19, %v4928_v24  ;;  %v2950_v4 = vpop.permute.xlu1 %2949  ;;  %v1662_v63 = vld [vmem:[%s4844_s20 + $0xa8] sm:$0xff] }
 0x1b0   : > { %v2744_v30 = vpop.f32.mrf.mxu0 }
 0x1b1   : > { %v2857_v37 = vpop.f32.mrf.mxu1  ;;  %3050 = vst [vmem:[%s4844_s20 + $0x70] sm:$0xff] %v3018_v11  ;;  %v3019_v38 = vadd.f32 %v2987_v29, %v1656_v10  ;;  %v2988_v35 = vmul.f32 %v2935_v9, %v2854_v51  ;;  %v2856_v16 = vadd.f32 %v2855_v45, %v2743_v54  ;;  %v2745_v32 = vadd.f32 %v2744_v30, %v4934_v31  ;;  %v2955_v54 = vpop.permute.xlu0 %2954 }
 0x1b2   : > { %v2746_v6 = vpop.f32.mrf.mxu0 }
 0x1b3   : > { %v2859_v17 = vpop.f32.mrf.mxu1  ;;  %3051 = vst.msk [vmem:[%s4844_s20 + $0x78] sm:$0xff] %vm1609_vm0, %v3019_v38  ;;  %v3020_v1 = vadd.f32 %v2988_v35, %v4932_v8  ;;  %v2989_v24 = vmul.f32 %v2935_v9, %v2856_v16  ;;  %v2858_v47 = vadd.f32 %v2857_v37, %v2745_v32  ;;  %v2747_v3 = vadd.f32 %v2746_v6, %v4939_v41  ;;  %v1664_v37 = vld [vmem:[%s4844_s20 + $0xb8] sm:$0xff] }
 0x1b4   : > { %v2750_v42 = vpop.f32.mrf.mxu0 }
 0x1b5   : > { %v2863_v33 = vpop.f32.mrf.mxu1  ;;  %3052 = vst [vmem:[%s4844_s20 + $0x80] sm:$0xff] %v3020_v1  ;;  %v3021_v52 = vadd.f32 %v2989_v24, %v1658_v34  ;;  %v2990_v31 = vmul.f32 %v2940_v18, %v2858_v47  ;;  %v2860_v2 = vadd.f32 %v2859_v17, %v2747_v3  ;;  %v2751_v36 = vadd.f32 %v2750_v42, %v4945_v40  ;;  %v2960_v1 = vpop.permute.xlu1 %2959  ;;  %v1666_v3 = vld [vmem:[%s4844_s20 + $0xc8] sm:$0xff] }
 0x1b6   : > { %v2752_v13 = vpop.f32.mrf.mxu0 }
 0x1b7   : > { %v2865_v23 = vpop.f32.mrf.mxu1  ;;  %3053 = vst.msk [vmem:[%s4844_s20 + $0x88] sm:$0xff] %vm1609_vm0, %v3021_v52  ;;  %v3022_v8 = vadd.f32 %v2990_v31, %v4943_v58  ;;  %v2991_v41 = vmul.f32 %v2940_v18, %v2860_v2  ;;  %v2864_v27 = vadd.f32 %v2863_v33, %v2751_v36  ;;  %v2753_v0 = vadd.f32 %v2752_v13, %v4950_v39  ;;  %v2965_v13 = vpop.permute.xlu0 %2964 }
 0x1b8   : > { %v2754_v43 = vpop.f32.mrf.mxu0 }
 0x1b9   : > { %v2867_v57 = vpop.f32.mrf.mxu1  ;;  %3054 = vst [vmem:[%s4844_s20 + $0x90] sm:$0xff] %v3022_v8  ;;  %v3023_v12 = vadd.f32 %v2991_v41, %v1660_v26  ;;  %v2992_v40 = vmul.f32 %v2945_v20, %v2864_v27  ;;  %v2866_v50 = vadd.f32 %v2865_v23, %v2753_v0  ;;  %v2755_v22 = vadd.f32 %v2754_v43, %v4956_v44  ;;  %v1668_v8 = vld [vmem:[%s4844_s20 + $0xd8] sm:$0xff] }
 0x1ba   : > { %v2756_v55 = vpop.f32.mrf.mxu0 }
 0x1bb   : > { %v2869_v25 = vpop.f32.mrf.mxu1  ;;  %3055 = vst.msk [vmem:[%s4844_s20 + $0x98] sm:$0xff] %vm1609_vm0, %v3023_v12  ;;  %v3024_v58 = vadd.f32 %v2992_v40, %v4954_v7  ;;  %v2993_v39 = vmul.f32 %v2945_v20, %v2866_v50  ;;  %v2868_v28 = vadd.f32 %v2867_v57, %v2755_v22  ;;  %v2757_v5 = vadd.f32 %v2756_v55, %v4961_v46  ;;  %v5138_v50 = vld [vmem:[#allocation3_spill] sm:$0xff]  ;;  %v2970_v55 = vpop.permute.xlu1 %2969 }
 0x1bc   : > { %v2760_v15 = vpop.f32.mrf.mxu0 }
 0x1bd   : > { %v2873_v19 = vpop.f32.mrf.mxu1  ;;  %3056 = vst [vmem:[%s4844_s20 + $0xa0] sm:$0xff] %v3024_v58  ;;  %v3025_v45 = vadd.f32 %v2993_v39, %v1662_v63  ;;  %v2994_v44 = vmul.f32 %v2950_v4, %v2868_v28  ;;  %v2870_v9 = vadd.f32 %v2869_v25, %v2757_v5  ;;  %v2761_v11 = vadd.f32 %v2760_v15, %v4967_v53  ;;  %v1670_v25 = vld [vmem:[%s4844_s20 + $0xe8] sm:$0xff]  ;;  %v1672_v15 = vld [vmem:[%s4844_s20 + $0xf8] sm:$0xff] }
 0x1be   : > { %v2762_v29 = vpop.f32.mrf.mxu0 }
 0x1bf   : > { %v2875_v51 = vpop.f32.mrf.mxu1  ;;  %3057 = vst.msk [vmem:[%s4844_s20 + $0xa8] sm:$0xff] %vm1609_vm0, %v3025_v45  ;;  %v3026_v7 = vadd.f32 %v2994_v44, %v4965_v14  ;;  %v2995_v46 = vmul.f32 %v2950_v4, %v2870_v9  ;;  %v2874_v10 = vadd.f32 %v2873_v19, %v2761_v11  ;;  %v2763_v30 = vadd.f32 %v2762_v29, %v4972_v49 }
 0x1c0   : > { %v2764_v38 = vpop.f32.mrf.mxu0 }
 0x1c1   : > { %v2877_v35 = vpop.f32.mrf.mxu1  ;;  %3058 = vst [vmem:[%s4844_s20 + $0xb0] sm:$0xff] %v3026_v7  ;;  %v3027_v16 = vadd.f32 %v2995_v46, %v1664_v37  ;;  %v2996_v53 = vmul.f32 %v2955_v54, %v2874_v10  ;;  %v2876_v32 = vadd.f32 %v2875_v51, %v2763_v30  ;;  %v2765_v6 = vadd.f32 %v2764_v38, %v4978_v59 }
 0x1c2   : > { %v2766_v17 = vpop.f32.mrf.mxu0 }
 0x1c3   : > { %v2879_v18 = vpop.f32.mrf.mxu1  ;;  %3059 = vst.msk [vmem:[%s4844_s20 + $0xb8] sm:$0xff] %vm1609_vm0, %v3027_v16  ;;  %v3028_v14 = vadd.f32 %v2996_v53, %v4976_v21  ;;  %v2997_v49 = vmul.f32 %v2955_v54, %v2876_v32  ;;  %v2878_v24 = vadd.f32 %v2877_v35, %v2765_v6  ;;  %v2767_v47 = vadd.f32 %v2766_v17, %v4983_v60 }
 0x1c4   : > { %v2770_v34 = vpop.f32.mrf.mxu0 }
 0x1c5   : > { %v2883_v42 = vpop.f32.mrf.mxu1  ;;  %3060 = vst [vmem:[%s4844_s20 + $0xc0] sm:$0xff] %v3028_v14  ;;  %v3029_v33 = vadd.f32 %v2997_v49, %v1666_v3  ;;  %v2998_v59 = vmul.f32 %v2960_v1, %v2878_v24  ;;  %v2880_v52 = vadd.f32 %v2879_v18, %v2767_v47  ;;  %v2771_v31 = vadd.f32 %v2770_v34, %v4989_v48 }
 0x1c6   : > { %v2772_v2 = vpop.f32.mrf.mxu0 }
 0x1c7   : > { %v2885_v36 = vpop.f32.mrf.mxu1  ;;  %3061 = vst.msk [vmem:[%s4844_s20 + $0xc8] sm:$0xff] %vm1609_vm0, %v3029_v33  ;;  %v3030_v21 = vadd.f32 %v2998_v59, %v4987_v56  ;;  %v2999_v60 = vmul.f32 %v2960_v1, %v2880_v52  ;;  %v2884_v23 = vadd.f32 %v2883_v42, %v2771_v31  ;;  %v2773_v20 = vadd.f32 %v2772_v2, %v4994_v62  ;;  %v5137_v56 = vld [vmem:[#allocation2_spill] sm:$0xff] }
 0x1c8   : > { %v2774_v41 = vpop.f32.mrf.mxu0 }
 0x1c9   : > { %v2887_v27 = vpop.f32.mrf.mxu1  ;;  %3062 = vst [vmem:[%s4844_s20 + $0xd0] sm:$0xff] %v3030_v21  ;;  %v3031_v0 = vadd.f32 %v2999_v60, %v1668_v8  ;;  %v3000_v48 = vmul.f32 %v2965_v13, %v2884_v23  ;;  %v2886_v26 = vadd.f32 %v2885_v36, %v2773_v20  ;;  %v2775_v43 = vadd.f32 %v2774_v41, %v5000_v61  ;;  %v5139_v61 = vld [vmem:[#allocation4_spill] sm:$0xff] }
 0x1ca   : > { %v2776_v57 = vpop.f32.mrf.mxu0 }
 0x1cb   : > { %3063 = vst.msk [vmem:[%s4844_s20 + $0xd8] sm:$0xff] %vm1609_vm0, %v3031_v0  ;;  %v3032_v12 = vadd.f32 %v3000_v48, %v5137_v56  ;;  %v3001_v62 = vmul.f32 %v2965_v13, %v2886_v26  ;;  %v2888_v40 = vadd.f32 %v2887_v27, %v2775_v43  ;;  %v2777_v22 = vadd.f32 %v2776_v57, %v5138_v50  ;;  %v2889_v4 = vpop.f32.mrf.mxu1 }
 0x1cd   : > { %3064 = vst [vmem:[%s4844_s20 + $0xe0] sm:$0xff] %v3032_v12  ;;  %v3033_v58 = vadd.f32 %v3001_v62, %v1670_v25  ;;  %v3002_v39 = vmul.f32 %v2970_v55, %v2888_v40  ;;  %v2890_v28 = vadd.f32 %v2889_v4, %v2777_v22 }
 0x1cf   : > { %3065 = vst.msk [vmem:[%s4844_s20 + $0xe8] sm:$0xff] %vm1609_vm0, %v3033_v58  ;;  %v3034_v5 = vadd.f32 %v3002_v39, %v5139_v61  ;;  %v3003_v63 = vmul.f32 %v2970_v55, %v2890_v28 }
 0x1d1   : > { %3066 = vst [vmem:[%s4844_s20 + $0xf0] sm:$0xff] %v3034_v5  ;;  %v3035_v19 = vadd.f32 %v3003_v63, %v1672_v15 }
 0x1d3   : > { %3067 = vst.msk [vmem:[%s4844_s20 + $0xf8] sm:$0xff] %vm1609_vm0, %v3035_v19 }
 0x1d4 PF: > { %s15_s18 = sadd.s32 1, %s3845_s18  }
 0x1d5   : > { %p12_p4 = scmp.ge.s32.totalorder %s15_s18, 4  }
 0x1d7   :  { %14 = sbr.rel (!%p12_p4) target bundleno = 1 (0x1), region = 76 }

</bundles_post_ra>
